<compile_context>
chip_gen: v5e
topology: v5e:2x2
jax: 0.10.0
libtpu: 0.0.40
codegen_flags: <defaults>
</compile_context>

<pallas_src>
import functools

import jax
import jax.numpy as jnp
from jax import lax
from jax.experimental import pallas as pl
from jax.experimental.pallas import tpu as pltpu

LN_EPS = 1e-5  # torch.nn.LayerNorm default


def _round_up(x, m):
    return (x + m - 1) // m * m


def _gelu(x):
    # tanh-approx GELU: tanh runs on the EUP slot (separate VLIW slot, nearly
    # free) instead of an erf VALU polynomial.  Max abs deviation from
    # torch.nn.GELU()'s exact erf form is ~3e-4; the self-check in __main__
    # compares against the exact-GELU f32 reference.
    return 0.5 * x * (1.0 + jnp.tanh(0.7978845608028654
                                     * (x + 0.044715 * x * x * x)))


def _gelu_exact(x):
    # exact (erf) GELU, torch.nn.GELU() default -- used by the f32 reference.
    return 0.5 * x * (1.0 + lax.erf(x * 0.7071067811865476))


def _layernorm_padded(x, gamma, beta, true_dim):
    # Lanes >= true_dim are exactly zero by construction (ZERO-padded weight
    # columns / biases), so plain lane sums equal the true sums; divide by the
    # UNPADDED width.  gamma/beta are zero-padded, so padded lanes come out
    # exactly 0 again (the pooling sum depends on this invariant).
    # One-pass stats var = E[x^2] - E[x]^2: padded-lane safe and halves the
    # reduction latency; f32 cancellation is benign here because |mean|/std of
    # a post-Linear activation is O(1).
    # TODO(synk): switch to a lane-masked two-pass variance if production
    # activations ever have |mean| >> std.
    inv_d = 1.0 / float(true_dim)
    mu = jnp.sum(x, axis=-1, keepdims=True) * inv_d
    ex2 = jnp.sum(x * x, axis=-1, keepdims=True) * inv_d
    var = ex2 - mu * mu
    return (x - mu) * lax.rsqrt(var + LN_EPS) * gamma + beta


# ----------------------------------------------------------------------------
# Pallas kernel: one batch tile per grid step (tb batches, tb*sl_pad rows).
# ----------------------------------------------------------------------------
def _relationnet_kernel(tb, sl_pad, ln1_dim, ln2_dim,
                        act_ref, pw_ref, ps_ref,
                        w1_ref, b1_ref, g1_ref, be1_ref, w2_ref, b2_ref,
                        hw1ps_ref, hw1q_ref, hb1_ref, hg1_ref, hbe1_ref,
                        hw2_ref, hb2_ref,
                        logits_ref):
    f32 = jnp.float32

    # ---- self.mlp : Linear -> (Dropout=id) -> LayerNorm -> GELU -> Linear
    # act = cat(qa_emb, rel_embed) pre-fused into one lane-dense K operand.
    h = jnp.dot(act_ref[...], w1_ref[...], preferred_element_type=f32) + b1_ref[...]
    h = _gelu(_layernorm_padded(h, g1_ref[...], be1_ref[...], ln1_dim))
    q = jnp.dot(h.astype(jnp.bfloat16), w2_ref[...],
                preferred_element_type=f32) + b2_ref[...]
    q = _gelu(q)                                   # == self.activation(qars_vecs)

    # ---- masked mean pooling: pw = validf / cnt (0 on masked / padded rows)
    qw = q * pw_ref[...]                                        # (tb*sl_pad, hP)
    pooled = jnp.sum(qw.reshape(tb, sl_pad, q.shape[-1]), axis=1)   # (tb, hP)

    # ---- self.hid2out on cat(path, pooled, sent); path|sent pre-fused -------
    z = (jnp.dot(ps_ref[...], hw1ps_ref[...], preferred_element_type=f32)
         + jnp.dot(pooled.astype(jnp.bfloat16), hw1q_ref[...],
                   preferred_element_type=f32)
         + hb1_ref[...])
    z = _gelu(_layernorm_padded(z, hg1_ref[...], hbe1_ref[...], ln2_dim))

    # ---- final Linear(fc, 1): VPU multiply + lane reduce (no N=1 MXU pass).
    # Lane-broadcast the logit column to 128 lanes so the per-step store is an
    # unmasked, lane-dense vst (wrapper slices back to (bs, 1)).
    logit = jnp.sum(z * hw2_ref[...], axis=-1, keepdims=True) + hb2_ref[...]
    logits_ref[...] = jnp.broadcast_to(logit, logits_ref.shape)


# ----------------------------------------------------------------------------
# Per-generation VMEM budgeting + batch-tile selection.
# ----------------------------------------------------------------------------
def _vmem_budget_bytes():
    # physical VMEM: v5e/v6e 128 MiB, v7x 64 MiB; keep ~25% headroom for
    # compiler temporaries / semaphores and cap at 96 MiB.
    try:
        cap = int(pltpu.get_tpu_info().vmem_capacity_bytes)
    except Exception:
        cap = 64 * 1024 * 1024            # conservative (v7x-sized) fallback
    return min(cap * 3 // 4, 96 * 1024 * 1024)


def _pick_batch_tile(bs, sl_pad, enc_pad, h2_pad, h_pad, ps_pad, fc_pad,
                     vmem_budget, max_rows=4096):
    """Largest batch tile tb (multiple of 8) whose working set fits the VMEM
    budget, capped at ~max_rows tuple rows per grid step, and clipped so the
    'parallel' grid keeps >= 2 steps when the batch allows (v7x megacore)."""
    bs8 = _round_up(bs, 8)

    def tile_bytes(tb):
        tbr = tb * sl_pad
        # double-buffered per-step streams (bf16 activation slab; the (tbr,1)
        # pw column and (tb,128) output are lane-padded to 128 lanes in VMEM)
        stream = 2 * (tbr * enc_pad * 2 + tbr * 128 * 4
                      + tb * ps_pad * 2 + tb * 128 * 4)
        # resident bf16 weights (constant index_map -> fetched once, but still
        # double-buffered by the default pipeliner; see pl.Buffered(1) TODO)
        wbytes = 2 * (2 * (enc_pad * h2_pad + h2_pad * h_pad
                           + ps_pad * fc_pad + h_pad * fc_pad)
                      + 4 * (3 * h2_pad + h_pad + 4 * fc_pad + 128))
        # f32 intermediates (h / q / qw slabs + hid2out temporaries)
        inter = 4 * tbr * (h2_pad + 2 * h_pad) + 4 * tb * (2 * fc_pad + h_pad)
        return stream + wbytes + inter

    rows_cap = max(8, (max_rows // sl_pad) // 8 * 8)
    tb = max(8, min(bs8, rows_cap))
    while tb > 8 and tile_bytes(tb) > vmem_budget:
        tb -= 8
    if bs8 >= 16:                     # keep nb >= 2 so both v7x TCs get work
        tb = min(tb, max(8, (bs8 // 2) // 8 * 8))
    return max(8, tb)


# ----------------------------------------------------------------------------
# Wrapper: embedding gathers + mask glue + padding in JAX, dense path in kernel.
# ----------------------------------------------------------------------------
def relationnet_forward(params, path_embedding, sent_vecs, qa_ids, rel_ids,
                        num_tuples, n_1hop_rel):
    bs, sl, _ = qa_ids.shape
    concept_dim = params["concept_emb"].shape[1]
    relation_dim = params["rel_emb"].shape[1]
    qa_dim = 2 * concept_dim
    enc_dim = qa_dim + relation_dim
    two_h = params["mlp_w1"].shape[1]
    hidden = params["mlp_w2"].shape[1]
    fc = params["hid_w1"].shape[1]
    path_dim = path_embedding.shape[1]
    sent_dim = sent_vecs.shape[1]
    ps_dim = path_dim + sent_dim
    assert params["mlp_w1"].shape[0] == enc_dim
    assert params["hid_w1"].shape[0] == path_dim + hidden + sent_dim

    # ---- padded sizes: lane dims -> multiples of 128, tuple dim -> 8 --------
    enc_pad = _round_up(enc_dim, 128)
    h2_pad = _round_up(two_h, 128)
    h_pad = _round_up(hidden, 128)
    fc_pad = _round_up(fc, 128)
    ps_pad = _round_up(ps_dim, 128)
    sl_pad = _round_up(sl, 8)

    # ---- batch tile + explicit VMEM limit (per-generation budget) -----------
    vmem_budget = _vmem_budget_bytes()
    tb = _pick_batch_tile(bs, sl_pad, enc_pad, h2_pad, h_pad, ps_pad, fc_pad,
                          vmem_budget)
    bs_pad = _round_up(bs, tb)
    tbr = tb * sl_pad                              # tuple rows per grid step
    nb = bs_pad // tb

    f32, bf16 = jnp.float32, jnp.bfloat16

    # ---- mask glue + pre-normalized pooling weights -------------------------
    mask = jnp.arange(sl)[None, :] >= num_tuples[:, None]
    all_masked = jnp.all(mask, axis=1)
    mask = mask.at[:, 0].set(jnp.where(all_masked, False, mask[:, 0]))
    validf = (~mask).astype(f32)                                 # (bs, sl)
    cnt = jnp.sum(validf, axis=1, keepdims=True)                 # >= 1 by fix
    pw = validf / cnt                                            # (bs, sl)
    pw = jnp.pad(pw, ((0, bs_pad - bs), (0, sl_pad - sl)))       # 0 on padding
    # TODO(synk): repack pw as a (tb, sl_pad) lane-dense tile; the (tbr, 1)
    # column is kept for lowering robustness and its lane-padded VMEM cost is
    # accounted for in the tile budget above.
    pw = pw.reshape(bs_pad * sl_pad, 1)

    # ---- embedding gathers (index glue kept in JAX) -------------------------
    # TODO(synk): at production concept_dim, move this gather into the kernel
    # (PrefetchScalarGridSpec + pl.ANY embedding tables + per-row DMA) to kill
    # the gather->HBM->kernel round trip of the (R, enc_dim) activations.
    qa_emb = params["concept_emb"][qa_ids.reshape(bs, sl * 2)]
    qa_emb = qa_emb.reshape(bs, sl, qa_dim)
    rel_flat = rel_ids.reshape(bs * sl)
    rel_e = params["rel_emb"][rel_flat]
    twohop = rel_flat >= n_1hop_rel
    off = jnp.maximum(rel_flat - n_1hop_rel, 0)
    rel_two = params["rel_emb"][off // n_1hop_rel] * params["rel_emb"][off % n_1hop_rel]
    rel_embed = jnp.where(twohop[:, None], rel_two, rel_e).reshape(bs, sl, relation_dim)

    # fused lane-dense activation slab: cat(qa_emb, rel_embed) -> (R, enc_pad)
    act = jnp.concatenate([qa_emb, rel_embed], axis=-1)
    act = jnp.pad(act, ((0, bs_pad - bs), (0, sl_pad - sl), (0, enc_pad - enc_dim)))
    act = act.reshape(bs_pad * sl_pad, enc_pad).astype(bf16)

    # fused path|sent per-batch operand -> (bs_pad, ps_pad)
    ps = jnp.concatenate([path_embedding, sent_vecs], axis=1)
    ps = jnp.pad(ps, ((0, bs_pad - bs), (0, ps_pad - ps_dim))).astype(bf16)

    # ---- weight padding / splitting ------------------------------------------
    # NOTE: every pad below is ZERO padding -- required for the padded-lanes-
    # stay-zero invariant (LN stats over true width + pooling correctness).
    def pad2(w, r, c, dtype):
        return jnp.pad(w, ((0, r - w.shape[0]), (0, c - w.shape[1]))).astype(dtype)

    w1 = pad2(params["mlp_w1"], enc_pad, h2_pad, bf16)
    b1 = pad2(params["mlp_b1"], 1, h2_pad, f32)
    g1 = pad2(params["mlp_g1"], 1, h2_pad, f32)
    be1 = pad2(params["mlp_be1"], 1, h2_pad, f32)
    w2 = pad2(params["mlp_w2"], h2_pad, h_pad, bf16)
    b2 = pad2(params["mlp_b2"], 1, h_pad, f32)

    hw1 = params["hid_w1"]
    # fuse the path and sent row blocks of hid_w1 (matches the fused ps slab);
    # pooled keeps its own row block -> still no in-kernel concat.
    hw1ps = pad2(jnp.concatenate([hw1[:path_dim], hw1[path_dim + hidden:]], 0),
                 ps_pad, fc_pad, bf16)
    hw1q = pad2(hw1[path_dim:path_dim + hidden], h_pad, fc_pad, bf16)
    hb1 = pad2(params["hid_b1"], 1, fc_pad, f32)
    hg1 = pad2(params["hid_g1"], 1, fc_pad, f32)
    hbe1 = pad2(params["hid_be1"], 1, fc_pad, f32)
    hw2 = pad2(params["hid_w2"].T, 1, fc_pad, f32)       # (1, fc_pad), f32
    hb2 = params["hid_b2"].astype(f32)                   # (1, 1)

    # ---- BlockSpecs: activations tiled over the batch grid, weights resident
    def tile(shape):
        return pl.BlockSpec(shape, lambda b: (b, 0))

    # constant index_map -> fetched once, stays VMEM-resident across the grid.
    # TODO(synk): pipeline_mode=pl.Buffered(1) would drop the dead second
    # buffer of these resident weights (matters on v7x at production widths).
    def resident(shape):
        return pl.BlockSpec(shape, lambda b: (0, 0))

    in_specs = [
        tile((tbr, enc_pad)), tile((tbr, 1)), tile((tb, ps_pad)),
        resident((enc_pad, h2_pad)), resident((1, h2_pad)),
        resident((1, h2_pad)), resident((1, h2_pad)),
        resident((h2_pad, h_pad)), resident((1, h_pad)),
        resident((ps_pad, fc_pad)), resident((h_pad, fc_pad)),
        resident((1, fc_pad)), resident((1, fc_pad)), resident((1, fc_pad)),
        resident((1, fc_pad)), resident((1, 1)),
    ]
    out_spec = pl.BlockSpec((tb, 128), lambda b: (b, 0))

    # advisory cost estimate so XLA schedules the gather/pad fusions around the
    # custom call instead of serializing.
    R = bs_pad * sl_pad
    flops = 2 * (R * enc_pad * h2_pad + R * h2_pad * h_pad
                 + bs_pad * (ps_pad + h_pad) * fc_pad) + R * (h2_pad + h_pad)
    transcendentals = R * (h2_pad + h_pad) + bs_pad * fc_pad
    bytes_accessed = (R * enc_pad * 2 + R * 4 + bs_pad * ps_pad * 2
                      + bs_pad * 128 * 4
                      + 2 * (enc_pad * h2_pad + h2_pad * h_pad
                             + ps_pad * fc_pad + h_pad * fc_pad))

    out = pl.pallas_call(
        functools.partial(_relationnet_kernel, tb, sl_pad, two_h, fc),
        out_shape=jax.ShapeDtypeStruct((bs_pad, 128), jnp.float32),
        grid=(nb,),
        in_specs=in_specs,
        out_specs=out_spec,
        compiler_params=pltpu.CompilerParams(
            dimension_semantics=("parallel",),       # batch tiles independent
            vmem_limit_bytes=int(vmem_budget)),
        cost_estimate=pl.CostEstimate(
            flops=int(flops), transcendentals=int(transcendentals),
            bytes_accessed=int(bytes_accessed)),
    )(act, pw, ps,
      w1, b1, g1, be1, w2, b2,
      hw1ps, hw1q, hb1, hg1, hbe1, hw2, hb2)

    # matches `return (logits, att_scores, None)` with att_scores=None
    return out[:bs, :1], None, None


# ----------------------------------------------------------------------------
# Pure-JAX f32 reference (torch-faithful math: exact erf GELU, two-pass LN,
# no Pallas / no padding / no bf16).
# ----------------------------------------------------------------------------
def _reference_dense(params, concat, validf, path_embedding, sent_vecs, bs, sl):
    def ln(x, g, b):
        mu = jnp.mean(x, axis=-1, keepdims=True)
        var = jnp.mean((x - mu) ** 2, axis=-1, keepdims=True)
        return (x - mu) * lax.rsqrt(var + LN_EPS) * g + b
    h = concat @ params["mlp_w1"] + params["mlp_b1"]
    h = _gelu_exact(ln(h, params["mlp_g1"], params["mlp_be1"]))
    h = h @ params["mlp_w2"] + params["mlp_b2"]
    q = _gelu_exact(h).reshape(bs, sl, -1)
    cnt = jnp.sum(validf, axis=1, keepdims=True)
    pooled = jnp.sum(q * validf[:, :, None], axis=1) / cnt
    cat2 = jnp.concatenate([path_embedding, pooled, sent_vecs], axis=1)
    z = cat2 @ params["hid_w1"] + params["hid_b1"]
    z = _gelu_exact(ln(z, params["hid_g1"], params["hid_be1"]))
    return z @ params["hid_w2"] + params["hid_b2"]


if __name__ == "__main__":
    # small, module-consistent sizes (bs=16 -> 2 grid steps; larger bs grows
    # the batch tile automatically up to the per-generation VMEM budget)
    bs, sl = 16, 8                      # batch, max_tuple_num
    concept_num, concept_dim = 64, 32   # concept_in_dim == concept_dim
    n_1hop_rel = 6
    relation_num, relation_dim = n_1hop_rel * (n_1hop_rel + 1), 32   # 42
    sent_dim, hidden_size = 32, 32
    fc_size = 32
    path_embedding_dim = 64
    encoder_dim = 2 * concept_dim + relation_dim                     # 96
    hid_in_dim = path_embedding_dim + hidden_size + sent_dim         # 128

    key = jax.random.PRNGKey(0)
    ks = jax.random.split(key, 20)

    def nrm(k, shape, std=0.05):
        return (std * jax.random.normal(k, shape)).astype(jnp.float32)

    params = {
        # embeddings
        "concept_emb": nrm(ks[0], (concept_num, concept_dim), 0.02),
        "rel_emb": nrm(ks[1], (relation_num, relation_dim), 0.02),
        # self.mlp : Linear(enc, 2h) -> LN(2h) -> GELU -> Linear(2h, h)
        "mlp_w1": nrm(ks[2], (encoder_dim, 2 * hidden_size)),
        "mlp_b1": nrm(ks[3], (1, 2 * hidden_size), 0.02),
        "mlp_g1": 1.0 + nrm(ks[4], (1, 2 * hidden_size), 0.02),
        "mlp_be1": nrm(ks[5], (1, 2 * hidden_size), 0.02),
        "mlp_w2": nrm(ks[6], (2 * hidden_size, hidden_size)),
        "mlp_b2": nrm(ks[7], (1, hidden_size), 0.02),
        # self.hid2out : Linear(in, fc) -> LN(fc) -> GELU -> Linear(fc, 1)
        "hid_w1": nrm(ks[8], (hid_in_dim, fc_size)),
        "hid_b1": nrm(ks[9], (1, fc_size), 0.02),
        "hid_g1": 1.0 + nrm(ks[10], (1, fc_size), 0.02),
        "hid_be1": nrm(ks[11], (1, fc_size), 0.02),
        "hid_w2": nrm(ks[12], (fc_size, 1)),
        "hid_b2": nrm(ks[13], (1, 1), 0.02),
    }

    path_embedding = nrm(ks[14], (bs, path_embedding_dim), 1.0)
    sent_vecs = nrm(ks[15], (bs, sent_dim), 1.0)
    qa_ids = jax.random.randint(ks[16], (bs, sl, 2), 0, concept_num, dtype=jnp.int32)
    rel_ids = jax.random.randint(ks[17], (bs, sl), 0, relation_num, dtype=jnp.int32)
    # rows with 0 tuples exercise the "mask[mask.all(1), 0] = 0" fix
    num_tuples = jnp.array([3, 0, 8, 5, 1, 7, 2, 4, 6, 8, 0, 3, 5, 2, 7, 1],
                           dtype=jnp.int32)

    logits, att_scores, _ = relationnet_forward(
        params, path_embedding, sent_vecs, qa_ids, rel_ids, num_tuples, n_1hop_rel)
    logits = jax.block_until_ready(logits)
    assert logits.shape == (bs, 1) and logits.dtype == jnp.float32

    # correctness check against a torch-faithful pure-JAX f32 reference
    mask = jnp.arange(sl)[None, :] >= num_tuples[:, None]
    all_masked = jnp.all(mask, axis=1)
    mask = mask.at[:, 0].set(jnp.where(all_masked, False, mask[:, 0]))
    validf = (~mask).astype(jnp.float32)
    qa_emb = params["concept_emb"][qa_ids.reshape(bs, sl * 2)].reshape(bs, sl, -1)
    rel_flat = rel_ids.reshape(bs * sl)
    rel_e = params["rel_emb"][rel_flat]
    twohop = rel_flat >= n_1hop_rel
    off = jnp.maximum(rel_flat - n_1hop_rel, 0)
    rel_two = params["rel_emb"][off // n_1hop_rel] * params["rel_emb"][off % n_1hop_rel]
    rel_embed = jnp.where(twohop[:, None], rel_two, rel_e).reshape(bs, sl, -1)
    concat = jnp.concatenate([qa_emb, rel_embed], -1).reshape(bs * sl, -1)
    ref = _reference_dense(params, concat, validf, path_embedding, sent_vecs, bs, sl)
    assert jnp.allclose(logits, ref, rtol=3e-2, atol=3e-2), (logits, ref)

    # TODO(synk): saliency / ablation branches, attention-pool variants
    # (multihead_pool / att_pool), goccl / bypass_logits / end2end returns and
    # train-mode dropout are config-dependent control flow and are not lowered.
    print("KERNEL_OK")
</pallas_src>

<mosaic_0001>
module attributes {stable_mosaic.version = 11 : i64} {
  func.func @_relationnet_kernel(%arg0: i32, %arg1: memref<64x128xbf16, #tpu.memory_space<vmem>>, %arg2: memref<64x1xf32, #tpu.memory_space<vmem>>, %arg3: memref<8x128xbf16, #tpu.memory_space<vmem>>, %arg4: memref<128x128xbf16, #tpu.memory_space<vmem>>, %arg5: memref<1x128xf32, #tpu.memory_space<vmem>>, %arg6: memref<1x128xf32, #tpu.memory_space<vmem>>, %arg7: memref<1x128xf32, #tpu.memory_space<vmem>>, %arg8: memref<128x128xbf16, #tpu.memory_space<vmem>>, %arg9: memref<1x128xf32, #tpu.memory_space<vmem>>, %arg10: memref<128x128xbf16, #tpu.memory_space<vmem>>, %arg11: memref<128x128xbf16, #tpu.memory_space<vmem>>, %arg12: memref<1x128xf32, #tpu.memory_space<vmem>>, %arg13: memref<1x128xf32, #tpu.memory_space<vmem>>, %arg14: memref<1x128xf32, #tpu.memory_space<vmem>>, %arg15: memref<1x128xf32, #tpu.memory_space<vmem>>, %arg16: memref<1x1xf32, #tpu.memory_space<vmem>>, %arg17: memref<8x128xf32, #tpu.memory_space<vmem>>) attributes {dimension_semantics = [#tpu.dimension_semantics<parallel>], iteration_bounds = array<i64: 2>, scalar_prefetch = 0 : i64, scratch_operands = 0 : i64, tpu.core_type = #tpu.core_type<tc>, window_params = [{transform_indices = @transform_0, window_bounds = array<i64: 64, 128>}, {transform_indices = @transform_1, window_bounds = array<i64: 64, 1>}, {transform_indices = @transform_2, window_bounds = array<i64: 8, 128>}, {pipeline_mode = #tpu.pipeline_mode<synchronous>, transform_indices = @transform_3, window_bounds = array<i64: 128, 128>}, {pipeline_mode = #tpu.pipeline_mode<synchronous>, transform_indices = @transform_4, window_bounds = array<i64: 1, 128>}, {pipeline_mode = #tpu.pipeline_mode<synchronous>, transform_indices = @transform_5, window_bounds = array<i64: 1, 128>}, {pipeline_mode = #tpu.pipeline_mode<synchronous>, transform_indices = @transform_6, window_bounds = array<i64: 1, 128>}, {pipeline_mode = #tpu.pipeline_mode<synchronous>, transform_indices = @transform_7, window_bounds = array<i64: 128, 128>}, {pipeline_mode = #tpu.pipeline_mode<synchronous>, transform_indices = @transform_8, window_bounds = array<i64: 1, 128>}, {pipeline_mode = #tpu.pipeline_mode<synchronous>, transform_indices = @transform_9, window_bounds = array<i64: 128, 128>}, {pipeline_mode = #tpu.pipeline_mode<synchronous>, transform_indices = @transform_10, window_bounds = array<i64: 128, 128>}, {pipeline_mode = #tpu.pipeline_mode<synchronous>, transform_indices = @transform_11, window_bounds = array<i64: 1, 128>}, {pipeline_mode = #tpu.pipeline_mode<synchronous>, transform_indices = @transform_12, window_bounds = array<i64: 1, 128>}, {pipeline_mode = #tpu.pipeline_mode<synchronous>, transform_indices = @transform_13, window_bounds = array<i64: 1, 128>}, {pipeline_mode = #tpu.pipeline_mode<synchronous>, transform_indices = @transform_14, window_bounds = array<i64: 1, 128>}, {pipeline_mode = #tpu.pipeline_mode<synchronous>, transform_indices = @transform_15, window_bounds = array<i64: 1, 1>}, {transform_indices = @transform_16, window_bounds = array<i64: 8, 128>}]} {
    %c0 = arith.constant 0 : index
    %c0_0 = arith.constant 0 : index
    %0 = vector.load %arg1[%c0, %c0_0] : memref<64x128xbf16, #tpu.memory_space<vmem>>, vector<64x128xbf16>
    %c0_1 = arith.constant 0 : index
    %c0_2 = arith.constant 0 : index
    %1 = vector.load %arg4[%c0_1, %c0_2] : memref<128x128xbf16, #tpu.memory_space<vmem>>, vector<128x128xbf16>
    %cst = arith.constant dense<0.000000e+00> : vector<64x128xf32>
    %2 = tpu.matmul %0, %1, %cst {dimension_numbers = #tpu.dot_dimension_numbers<[1], [0], [0], [1], [0, 0, 1, 1], [], []>} : vector<64x128xbf16>, vector<128x128xbf16>, vector<64x128xf32> -> vector<64x128xf32>
    %c0_3 = arith.constant 0 : index
    %c0_4 = arith.constant 0 : index
    %3 = vector.load %arg5[%c0_3, %c0_4] : memref<1x128xf32, #tpu.memory_space<vmem>>, vector<1x128xf32>
    %4 = vector.broadcast %3 : vector<1x128xf32> to vector<64x128xf32>
    %5 = arith.addf %2, %4 : vector<64x128xf32>
    %c0_5 = arith.constant 0 : index
    %c0_6 = arith.constant 0 : index
    %6 = vector.load %arg6[%c0_5, %c0_6] : memref<1x128xf32, #tpu.memory_space<vmem>>, vector<1x128xf32>
    %c0_7 = arith.constant 0 : index
    %c0_8 = arith.constant 0 : index
    %7 = vector.load %arg7[%c0_7, %c0_8] : memref<1x128xf32, #tpu.memory_space<vmem>>, vector<1x128xf32>
    %cst_9 = arith.constant dense<0.000000e+00> : vector<64xf32>
    %8 = vector.multi_reduction <add>, %5, %cst_9 [1] : vector<64x128xf32> to vector<64xf32>
    %9 = vector.shape_cast %8 : vector<64xf32> to vector<64x1xf32>
    %cst_10 = arith.constant 1.562500e-02 : f32
    %10 = vector.broadcast %cst_10 : f32 to vector<64x1xf32>
    %11 = arith.mulf %9, %10 : vector<64x1xf32>
    %12 = arith.mulf %5, %5 : vector<64x128xf32>
    %cst_11 = arith.constant dense<0.000000e+00> : vector<64xf32>
    %13 = vector.multi_reduction <add>, %12, %cst_11 [1] : vector<64x128xf32> to vector<64xf32>
    %14 = vector.shape_cast %13 : vector<64xf32> to vector<64x1xf32>
    %cst_12 = arith.constant 1.562500e-02 : f32
    %15 = vector.broadcast %cst_12 : f32 to vector<64x1xf32>
    %16 = arith.mulf %14, %15 : vector<64x1xf32>
    %17 = arith.mulf %11, %11 : vector<64x1xf32>
    %18 = arith.subf %16, %17 : vector<64x1xf32>
    %19 = vector.broadcast %11 : vector<64x1xf32> to vector<64x128xf32>
    %20 = arith.subf %5, %19 : vector<64x128xf32>
    %cst_13 = arith.constant 9.99999974E-6 : f32
    %21 = vector.broadcast %cst_13 : f32 to vector<64x1xf32>
    %22 = arith.addf %18, %21 : vector<64x1xf32>
    %23 = math.rsqrt %22 : vector<64x1xf32>
    %24 = vector.broadcast %23 : vector<64x1xf32> to vector<64x128xf32>
    %25 = arith.mulf %20, %24 : vector<64x128xf32>
    %26 = vector.broadcast %6 : vector<1x128xf32> to vector<64x128xf32>
    %27 = arith.mulf %25, %26 : vector<64x128xf32>
    %28 = vector.broadcast %7 : vector<1x128xf32> to vector<64x128xf32>
    %29 = arith.addf %27, %28 : vector<64x128xf32>
    %cst_14 = arith.constant 5.000000e-01 : f32
    %30 = vector.broadcast %cst_14 : f32 to vector<64x128xf32>
    %31 = arith.mulf %30, %29 : vector<64x128xf32>
    %cst_15 = arith.constant 4.471500e-02 : f32
    %32 = vector.broadcast %cst_15 : f32 to vector<64x128xf32>
    %33 = arith.mulf %32, %29 : vector<64x128xf32>
    %34 = arith.mulf %33, %29 : vector<64x128xf32>
    %35 = arith.mulf %34, %29 : vector<64x128xf32>
    %36 = arith.addf %29, %35 : vector<64x128xf32>
    %cst_16 = arith.constant 0.797884583 : f32
    %37 = vector.broadcast %cst_16 : f32 to vector<64x128xf32>
    %38 = arith.mulf %37, %36 : vector<64x128xf32>
    %39 = math.tanh %38 : vector<64x128xf32>
    %cst_17 = arith.constant 1.000000e+00 : f32
    %40 = vector.broadcast %cst_17 : f32 to vector<64x128xf32>
    %41 = arith.addf %40, %39 : vector<64x128xf32>
    %42 = arith.mulf %31, %41 : vector<64x128xf32>
    %43 = arith.truncf %42 : vector<64x128xf32> to vector<64x128xbf16>
    %c0_18 = arith.constant 0 : index
    %c0_19 = arith.constant 0 : index
    %44 = vector.load %arg8[%c0_18, %c0_19] : memref<128x128xbf16, #tpu.memory_space<vmem>>, vector<128x128xbf16>
    %cst_20 = arith.constant dense<0.000000e+00> : vector<64x128xf32>
    %45 = tpu.matmul %43, %44, %cst_20 {dimension_numbers = #tpu.dot_dimension_numbers<[1], [0], [0], [1], [0, 0, 1, 1], [], []>} : vector<64x128xbf16>, vector<128x128xbf16>, vector<64x128xf32> -> vector<64x128xf32>
    %c0_21 = arith.constant 0 : index
    %c0_22 = arith.constant 0 : index
    %46 = vector.load %arg9[%c0_21, %c0_22] : memref<1x128xf32, #tpu.memory_space<vmem>>, vector<1x128xf32>
    %47 = vector.broadcast %46 : vector<1x128xf32> to vector<64x128xf32>
    %48 = arith.addf %45, %47 : vector<64x128xf32>
    %cst_23 = arith.constant 5.000000e-01 : f32
    %49 = vector.broadcast %cst_23 : f32 to vector<64x128xf32>
    %50 = arith.mulf %49, %48 : vector<64x128xf32>
    %cst_24 = arith.constant 4.471500e-02 : f32
    %51 = vector.broadcast %cst_24 : f32 to vector<64x128xf32>
    %52 = arith.mulf %51, %48 : vector<64x128xf32>
    %53 = arith.mulf %52, %48 : vector<64x128xf32>
    %54 = arith.mulf %53, %48 : vector<64x128xf32>
    %55 = arith.addf %48, %54 : vector<64x128xf32>
    %cst_25 = arith.constant 0.797884583 : f32
    %56 = vector.broadcast %cst_25 : f32 to vector<64x128xf32>
    %57 = arith.mulf %56, %55 : vector<64x128xf32>
    %58 = math.tanh %57 : vector<64x128xf32>
    %cst_26 = arith.constant 1.000000e+00 : f32
    %59 = vector.broadcast %cst_26 : f32 to vector<64x128xf32>
    %60 = arith.addf %59, %58 : vector<64x128xf32>
    %61 = arith.mulf %50, %60 : vector<64x128xf32>
    %c0_27 = arith.constant 0 : index
    %c0_28 = arith.constant 0 : index
    %62 = vector.load %arg2[%c0_27, %c0_28] : memref<64x1xf32, #tpu.memory_space<vmem>>, vector<64x1xf32>
    %63 = vector.broadcast %62 : vector<64x1xf32> to vector<64x128xf32>
    %64 = arith.mulf %61, %63 : vector<64x128xf32>
    %65 = vector.shape_cast %64 : vector<64x128xf32> to vector<8x8x128xf32>
    %cst_29 = arith.constant dense<0.000000e+00> : vector<8x128xf32>
    %66 = vector.multi_reduction <add>, %65, %cst_29 [1] : vector<8x8x128xf32> to vector<8x128xf32>
    %c0_30 = arith.constant 0 : index
    %c0_31 = arith.constant 0 : index
    %67 = vector.load %arg3[%c0_30, %c0_31] : memref<8x128xbf16, #tpu.memory_space<vmem>>, vector<8x128xbf16>
    %c0_32 = arith.constant 0 : index
    %c0_33 = arith.constant 0 : index
    %68 = vector.load %arg10[%c0_32, %c0_33] : memref<128x128xbf16, #tpu.memory_space<vmem>>, vector<128x128xbf16>
    %cst_34 = arith.constant dense<0.000000e+00> : vector<8x128xf32>
    %69 = tpu.matmul %67, %68, %cst_34 {dimension_numbers = #tpu.dot_dimension_numbers<[1], [0], [0], [1], [0, 0, 1, 1], [], []>} : vector<8x128xbf16>, vector<128x128xbf16>, vector<8x128xf32> -> vector<8x128xf32>
    %70 = arith.truncf %66 : vector<8x128xf32> to vector<8x128xbf16>
    %c0_35 = arith.constant 0 : index
    %c0_36 = arith.constant 0 : index
    %71 = vector.load %arg11[%c0_35, %c0_36] : memref<128x128xbf16, #tpu.memory_space<vmem>>, vector<128x128xbf16>
    %cst_37 = arith.constant dense<0.000000e+00> : vector<8x128xf32>
    %72 = tpu.matmul %70, %71, %cst_37 {dimension_numbers = #tpu.dot_dimension_numbers<[1], [0], [0], [1], [0, 0, 1, 1], [], []>} : vector<8x128xbf16>, vector<128x128xbf16>, vector<8x128xf32> -> vector<8x128xf32>
    %73 = arith.addf %69, %72 : vector<8x128xf32>
    %c0_38 = arith.constant 0 : index
    %c0_39 = arith.constant 0 : index
    %74 = vector.load %arg12[%c0_38, %c0_39] : memref<1x128xf32, #tpu.memory_space<vmem>>, vector<1x128xf32>
    %75 = vector.broadcast %74 : vector<1x128xf32> to vector<8x128xf32>
    %76 = arith.addf %73, %75 : vector<8x128xf32>
    %c0_40 = arith.constant 0 : index
    %c0_41 = arith.constant 0 : index
    %77 = vector.load %arg13[%c0_40, %c0_41] : memref<1x128xf32, #tpu.memory_space<vmem>>, vector<1x128xf32>
    %c0_42 = arith.constant 0 : index
    %c0_43 = arith.constant 0 : index
    %78 = vector.load %arg14[%c0_42, %c0_43] : memref<1x128xf32, #tpu.memory_space<vmem>>, vector<1x128xf32>
    %cst_44 = arith.constant dense<0.000000e+00> : vector<8xf32>
    %79 = vector.multi_reduction <add>, %76, %cst_44 [1] : vector<8x128xf32> to vector<8xf32>
    %80 = vector.shape_cast %79 : vector<8xf32> to vector<8x1xf32>
    %cst_45 = arith.constant 3.125000e-02 : f32
    %81 = vector.broadcast %cst_45 : f32 to vector<8x1xf32>
    %82 = arith.mulf %80, %81 : vector<8x1xf32>
    %83 = arith.mulf %76, %76 : vector<8x128xf32>
    %cst_46 = arith.constant dense<0.000000e+00> : vector<8xf32>
    %84 = vector.multi_reduction <add>, %83, %cst_46 [1] : vector<8x128xf32> to vector<8xf32>
    %85 = vector.shape_cast %84 : vector<8xf32> to vector<8x1xf32>
    %cst_47 = arith.constant 3.125000e-02 : f32
    %86 = vector.broadcast %cst_47 : f32 to vector<8x1xf32>
    %87 = arith.mulf %85, %86 : vector<8x1xf32>
    %88 = arith.mulf %82, %82 : vector<8x1xf32>
    %89 = arith.subf %87, %88 : vector<8x1xf32>
    %90 = vector.broadcast %82 : vector<8x1xf32> to vector<8x128xf32>
    %91 = arith.subf %76, %90 : vector<8x128xf32>
    %cst_48 = arith.constant 9.99999974E-6 : f32
    %92 = vector.broadcast %cst_48 : f32 to vector<8x1xf32>
    %93 = arith.addf %89, %92 : vector<8x1xf32>
    %94 = math.rsqrt %93 : vector<8x1xf32>
    %95 = vector.broadcast %94 : vector<8x1xf32> to vector<8x128xf32>
    %96 = arith.mulf %91, %95 : vector<8x128xf32>
    %97 = vector.broadcast %77 : vector<1x128xf32> to vector<8x128xf32>
    %98 = arith.mulf %96, %97 : vector<8x128xf32>
    %99 = vector.broadcast %78 : vector<1x128xf32> to vector<8x128xf32>
    %100 = arith.addf %98, %99 : vector<8x128xf32>
    %cst_49 = arith.constant 5.000000e-01 : f32
    %101 = vector.broadcast %cst_49 : f32 to vector<8x128xf32>
    %102 = arith.mulf %101, %100 : vector<8x128xf32>
    %cst_50 = arith.constant 4.471500e-02 : f32
    %103 = vector.broadcast %cst_50 : f32 to vector<8x128xf32>
    %104 = arith.mulf %103, %100 : vector<8x128xf32>
    %105 = arith.mulf %104, %100 : vector<8x128xf32>
    %106 = arith.mulf %105, %100 : vector<8x128xf32>
    %107 = arith.addf %100, %106 : vector<8x128xf32>
    %cst_51 = arith.constant 0.797884583 : f32
    %108 = vector.broadcast %cst_51 : f32 to vector<8x128xf32>
    %109 = arith.mulf %108, %107 : vector<8x128xf32>
    %110 = math.tanh %109 : vector<8x128xf32>
    %cst_52 = arith.constant 1.000000e+00 : f32
    %111 = vector.broadcast %cst_52 : f32 to vector<8x128xf32>
    %112 = arith.addf %111, %110 : vector<8x128xf32>
    %113 = arith.mulf %102, %112 : vector<8x128xf32>
    %c0_53 = arith.constant 0 : index
    %c0_54 = arith.constant 0 : index
    %114 = vector.load %arg15[%c0_53, %c0_54] : memref<1x128xf32, #tpu.memory_space<vmem>>, vector<1x128xf32>
    %115 = vector.broadcast %114 : vector<1x128xf32> to vector<8x128xf32>
    %116 = arith.mulf %113, %115 : vector<8x128xf32>
    %cst_55 = arith.constant dense<0.000000e+00> : vector<8xf32>
    %117 = vector.multi_reduction <add>, %116, %cst_55 [1] : vector<8x128xf32> to vector<8xf32>
    %118 = vector.shape_cast %117 : vector<8xf32> to vector<8x1xf32>
    %c0_56 = arith.constant 0 : index
    %c0_57 = arith.constant 0 : index
    %119 = vector.load %arg16[%c0_56, %c0_57] : memref<1x1xf32, #tpu.memory_space<vmem>>, vector<1x1xf32>
    %120 = vector.broadcast %119 : vector<1x1xf32> to vector<8x1xf32>
    %121 = arith.addf %118, %120 : vector<8x1xf32>
    %122 = vector.shape_cast %121 : vector<8x1xf32> to vector<8x1xf32>
    %123 = vector.broadcast %122 : vector<8x1xf32> to vector<8x128xf32>
    %c0_58 = arith.constant 0 : index
    %c0_59 = arith.constant 0 : index
    %124 = vector.load %arg17[%c0_58, %c0_59] : memref<8x128xf32, #tpu.memory_space<vmem>>, vector<8x128xf32>
    tpu.vector_store %arg17[%c0_58, %c0_59], %123 {strides = array<i32>} : memref<8x128xf32, #tpu.memory_space<vmem>>, vector<8x128xf32>,
    return
  }
  func.func @transform_0(%arg0: i32) -> (i32, i32) {
    %c0_i32 = arith.constant 0 : i32
    %c0_i32_0 = arith.constant 0 : i32
    return %arg0, %c0_i32 : i32, i32
  }
  func.func @transform_1(%arg0: i32) -> (i32, i32) {
    %c0_i32 = arith.constant 0 : i32
    %c0_i32_0 = arith.constant 0 : i32
    return %arg0, %c0_i32 : i32, i32
  }
  func.func @transform_2(%arg0: i32) -> (i32, i32) {
    %c0_i32 = arith.constant 0 : i32
    %c0_i32_0 = arith.constant 0 : i32
    return %arg0, %c0_i32 : i32, i32
  }
  func.func @transform_3(%arg0: i32) -> (i32, i32) {
    %c0_i32 = arith.constant 0 : i32
    %c0_i32_0 = arith.constant 0 : i32
    %c0_i32_1 = arith.constant 0 : i32
    return %c0_i32, %c0_i32_0 : i32, i32
  }
  func.func @transform_4(%arg0: i32) -> (i32, i32) {
    %c0_i32 = arith.constant 0 : i32
    %c0_i32_0 = arith.constant 0 : i32
    %c0_i32_1 = arith.constant 0 : i32
    return %c0_i32, %c0_i32_0 : i32, i32
  }
  func.func @transform_5(%arg0: i32) -> (i32, i32) {
    %c0_i32 = arith.constant 0 : i32
    %c0_i32_0 = arith.constant 0 : i32
    %c0_i32_1 = arith.constant 0 : i32
    return %c0_i32, %c0_i32_0 : i32, i32
  }
  func.func @transform_6(%arg0: i32) -> (i32, i32) {
    %c0_i32 = arith.constant 0 : i32
    %c0_i32_0 = arith.constant 0 : i32
    %c0_i32_1 = arith.constant 0 : i32
    return %c0_i32, %c0_i32_0 : i32, i32
  }
  func.func @transform_7(%arg0: i32) -> (i32, i32) {
    %c0_i32 = arith.constant 0 : i32
    %c0_i32_0 = arith.constant 0 : i32
    %c0_i32_1 = arith.constant 0 : i32
    return %c0_i32, %c0_i32_0 : i32, i32
  }
  func.func @transform_8(%arg0: i32) -> (i32, i32) {
    %c0_i32 = arith.constant 0 : i32
    %c0_i32_0 = arith.constant 0 : i32
    %c0_i32_1 = arith.constant 0 : i32
    return %c0_i32, %c0_i32_0 : i32, i32
  }
  func.func @transform_9(%arg0: i32) -> (i32, i32) {
    %c0_i32 = arith.constant 0 : i32
    %c0_i32_0 = arith.constant 0 : i32
    %c0_i32_1 = arith.constant 0 : i32
    return %c0_i32, %c0_i32_0 : i32, i32
  }
  func.func @transform_10(%arg0: i32) -> (i32, i32) {
    %c0_i32 = arith.constant 0 : i32
    %c0_i32_0 = arith.constant 0 : i32
    %c0_i32_1 = arith.constant 0 : i32
    return %c0_i32, %c0_i32_0 : i32, i32
  }
  func.func @transform_11(%arg0: i32) -> (i32, i32) {
    %c0_i32 = arith.constant 0 : i32
    %c0_i32_0 = arith.constant 0 : i32
    %c0_i32_1 = arith.constant 0 : i32
    return %c0_i32, %c0_i32_0 : i32, i32
  }
  func.func @transform_12(%arg0: i32) -> (i32, i32) {
    %c0_i32 = arith.constant 0 : i32
    %c0_i32_0 = arith.constant 0 : i32
    %c0_i32_1 = arith.constant 0 : i32
    return %c0_i32, %c0_i32_0 : i32, i32
  }
  func.func @transform_13(%arg0: i32) -> (i32, i32) {
    %c0_i32 = arith.constant 0 : i32
    %c0_i32_0 = arith.constant 0 : i32
    %c0_i32_1 = arith.constant 0 : i32
    return %c0_i32, %c0_i32_0 : i32, i32
  }
  func.func @transform_14(%arg0: i32) -> (i32, i32) {
    %c0_i32 = arith.constant 0 : i32
    %c0_i32_0 = arith.constant 0 : i32
    %c0_i32_1 = arith.constant 0 : i32
    return %c0_i32, %c0_i32_0 : i32, i32
  }
  func.func @transform_15(%arg0: i32) -> (i32, i32) {
    %c0_i32 = arith.constant 0 : i32
    %c0_i32_0 = arith.constant 0 : i32
    %c0_i32_1 = arith.constant 0 : i32
    return %c0_i32, %c0_i32_0 : i32, i32
  }
  func.func @transform_16(%arg0: i32) -> (i32, i32) {
    %c0_i32 = arith.constant 0 : i32
    %c0_i32_0 = arith.constant 0 : i32
    return %arg0, %c0_i32 : i32, i32
  }
}

</mosaic_0001>

<bundles_post_ra>
// kernel: tpu_custom_call.1
= control target key start
LH: loop header
LB: loop body
LE: loop exit
PB: predicated region body
PF: predicated region fallthrough
CT: control target
= control target key end

     0   :  { %s2797_s0 = inlined_call_operand.vmem [shape: bf16[128,128], index: 0, kind: input, shape index: {}]   ;;  %s2798_s1 = inlined_call_operand.vmem [shape: f32[128,1], index: 1, kind: input, shape index: {}]   ;;  %s2799_s2 = inlined_call_operand.hbm [shape: bf16[16,128], index: 2, kind: input, shape index: {}]   ;;  %s2800_s3 = inlined_call_operand.vmem [shape: bf16[128,128], index: 3, kind: input, shape index: {}]   ;;  %s2801_s4 = inlined_call_operand.vmem [shape: f32[1,128], index: 4, kind: input, shape index: {}]   ;;  %s2802_s5 = inlined_call_operand.vmem [shape: f32[1,128], index: 5, kind: input, shape index: {}]   ;;  %s2803_s6 = inlined_call_operand.vmem [shape: f32[1,128], index: 6, kind: input, shape index: {}]   ;;  %s2804_s7 = inlined_call_operand.hbm [shape: bf16[128,128], index: 7, kind: input, shape index: {}]   ;;  %s2805_s8 = inlined_call_operand.vmem [shape: f32[1,128], index: 8, kind: input, shape index: {}]   ;;  %s2806_s9 = inlined_call_operand.hbm [shape: bf16[128,128], index: 9, kind: input, shape index: {}]   ;;  %s2807_s10 = inlined_call_operand.hbm [shape: bf16[128,128], index: 10, kind: input, shape index: {}]   ;;  %s2808_s11 = inlined_call_operand.vmem [shape: f32[1,128], index: 11, kind: input, shape index: {}]   ;;  %s2809_s12 = inlined_call_operand.vmem [shape: f32[1,128], index: 12, kind: input, shape index: {}]   ;;  %s2810_s13 = inlined_call_operand.vmem [shape: f32[1,128], index: 13, kind: input, shape index: {}]   ;;  %s2811_s14 = inlined_call_operand.vmem [shape: f32[1,128], index: 14, kind: input, shape index: {}]   ;;  %s2812_s15 = inlined_call_operand.<no memory space> [shape: f32[1,1], index: 15, kind: input, shape index: {}]   ;;  %s2813_s16 = inlined_call_operand.hbm [shape: f32[16,128], index: 16, kind: output, shape index: {}]  }
   0x1   :  { %2819 = sst [smem:[#allocation21_spill]] %s2797_s0  ;;  %v21_v0 = vstv %s2812_s15 }
   0x2   :  { %2820 = sst [smem:[#allocation22_spill]] %s2804_s7  ;;  %22 = vst [vmem:[#allocation2] sm:$0x1] %v21_v0 }
   0x3   :  { %2821 = sst [smem:[#allocation23_spill]] %s2806_s9 }
   0x4   :  { %2822 = sst [smem:[#allocation24_spill]] %s2807_s10 }
   0x5   :  { %23 = vsyncpa [#allocation4], 0 }
   0x6   :  { %25 = vsyncpa [#allocation4 + $0x1], 0 }
   0x7   :  { %26 = vsyncpa [#allocation7], 0 }
   0x8   :  { %27 = vsyncpa [#allocation10], 0 }
   0x9   :  { %28 = vsyncpa [#allocation5], 0 }
   0xa   :  { %30 = vsyncpa [#allocation5 + $0x1], 0  ;;  %s2347_s23 = smov 0   ;;  %s2349_s24 = smov 0  }
   0xb   :  { %s2351_s25 = smov 0   ;;  %s2353_s26 = smov 0  }
   0xc LB: > { %2823 = sst [smem:[#allocation16_spill]] %s2239_s23  ;;  %s2371_s29 = sadd.s32 4294967295, %s2251_s26   ;;  %s2251_s26 = sphi %s2353_s26, %s2841_s26   ;;  %s2247_s25 = sphi %s2351_s25, %s2843_s25   ;;  %s2243_s24 = sphi %s2349_s24, %s2845_s24   ;;  %s2239_s23 = sphi %s2347_s23, %s2844_s23  }
   0xd   : > { %2824 = sst [smem:[#allocation17_spill]] %s2247_s25  ;;  %p1712_p0 = scmp.ge.s32.totalorder %s2251_s26, 1 }
   0xe   : > { %s2825_s7 = sld [smem:[#allocation22_spill]]  ;;  %p109_p1 = scmp.eq.s32.totalorder %s2371_s29, 0 }
   0xf   : > { %p418_p2 = scmp.lt.s32.totalorder %s2251_s26, 3  ;;  %s2253_s0 = smov [#allocation6]  }
  0x10   : > { %s443_s17 = sshll.u32 %s2253_s0, 4  ;;  %s2827_s9 = sld [smem:[#allocation23_spill]]  ;;  %s444_s17 = int_to_ptr.vmem [resolvable:$true] %s443_s17 }
  0x11   : > { %p2376_p3 = pnand %p1712_p0, %p418_p2  ;;  %s2829_s10 = sld [smem:[#allocation24_spill]] }
  0x12   : > { %s2254_s0 = smov [#allocation8]   ;;  %s2255_s19 = smov 64  }
  0x13   : > { %p1929_p4 = pneg %p2376_p3  ;;  %s460_s18 = sshll.u32 %s2254_s0, 4  ;;  %s461_s18 = int_to_ptr.vmem [resolvable:$true] %s460_s18 }
  0x14   : > { %s441_s28 = sshll.u32 %s2825_s7, 4  ;;  %s2256_s7 = smov 4   ;;  %s442_s28 = int_to_ptr.hbm [resolvable:$true] %s441_s28 }
  0x15   : > { %p2388_p6 = pnand %p1929_p4, %p109_p1  ;;  %s2257_s22 = smov [#allocation9]  }
  0x16   : > { %s458_s20 = sshll.u32 %s2827_s9, 4  ;;  %s474_s15 = sshll.u32 %s2257_s22, 4  ;;  %s459_s20 = int_to_ptr.hbm [resolvable:$true] %s458_s20  ;;  %s475_s15 = int_to_ptr.vmem [resolvable:$true] %s474_s15 }
  0x17   : > { %s472_s27 = sshll.u32 %s2829_s10, 4  ;;  %s1711_s0 = sadd.s32 4294967294, %s2251_s26   ;;  %s473_s27 = int_to_ptr.hbm [resolvable:$true] %s472_s27 }
  0x18   : > { %1932 = dma.hbm_to_vmem [thread:$0]  (!%p2388_p6), %s442_s28, 1024, %s444_s17, [#allocation7], %s2255_s19, %s2255_s19, %s2256_s7  }
  0x19   : > { %1935 = dma.hbm_to_vmem [thread:$0]  (!%p2388_p6), %s459_s20, 1024, %s461_s18, [#allocation7], %s2255_s19, %s2255_s19, %s2256_s7  }
  0x1a   : > { %1938 = dma.hbm_to_vmem [thread:$0]  (!%p2388_p6), %s473_s27, 1024, %s475_s15, [#allocation10], %s2255_s19, %s2255_s19, %s2256_s7  }
  0x1b   : > { %s2403_s9 = sadd.s32 1, %s2251_s26   ;;  %s95_s10 = sadd.s32 1, %s2247_s25 }
  0x1c   : > { %2830 = sst [smem:[#allocation18_spill]] %s2403_s9  ;;  %s92_s28 = ssub.s32 %s2251_s26, %s2403_s9 }
  0x1d   : > { %p102_p7 = scmp.ne.s32.totalorder %s2247_s25, %s2243_s24  ;;  %p93_p8 = scmp.eq.s32.totalorder %s92_s28, 0 }
  0x1e   : > { %p103_p9 = scmp.eq.s32.totalorder %s2251_s26, 0  ;;  %p108_p10 = scmp.ne.s32.totalorder %s2243_s24, %s2239_s23 }
  0x1f   : > { %p405_p11 = scmp.eq.s32.totalorder %s2371_s29, 1  ;;  %p411_p0 = scmp.eq.s32.totalorder %s1711_s0, 1 }
  0x20   : > { %s2415_s17 = scalar_select %p93_p8, %s2247_s25, %s95_s10  }
  0x21   : > { %p2419_p12 = por %p109_p1, %p108_p10  ;;  %p2423_p13 = por %p405_p11, %p102_p7 }
  0x22   : > { %2831 = sst [smem:[#allocation19_spill]] %s2415_s17  ;;  %p104_p2 = por %p103_p9, %p102_p7 }
  0x23   : > { %s521_s21 = sand.u32 1, %s2247_s25   ;;  %p2428_p4 = por %p411_p0, %p108_p10 }
  0x24   : > { %p1950_p6 = scmp.lt.s32.totalorder %s2251_s26, 2  ;;  %s1717_s18 = sshll.u32 %s521_s21, 2 }
  0x25   : > { %s2834_s27 = scalar_select %p2428_p4, 1, 0 }
  0x26   : > { %s1718_s10 = sshll.u32 %s2251_s26, 2  ;;  %s525_s17 = scalar_lea.vmem [#allocation3], %s1717_s18 }
  0x27   : > { %2835 = sst [smem:[#allocation20_spill]] %s2834_s27  ;;  %s529_s15 = scalar_lea.hbm %s2799_s2, %s1718_s10 }
  0x28   : > { %s531_s28 = sshll.u32 %s529_s15, 4  ;;  %s533_s9 = sshll.u32 %s525_s17, 4  ;;  %s532_s28 = int_to_ptr.hbm [resolvable:$true] %s531_s28  ;;  %s534_s9 = int_to_ptr.vmem [resolvable:$true] %s533_s9 }
  0x29   : > { %p2437_p8 = pnand %p1950_p6, %p104_p2  ;;  %s522_s25 = scalar_lea.sflag [#allocation4], %s521_s21 }
  0x2a   : > { %s2147_s23 = sshra.s32 %s532_s28, 4  ;;  %s2154_s17 = scalar_lea.hbm %s2799_s2, 8  ;;  %s2148_s23 = int_to_ptr.hbm [resolvable:$true] %s2147_s23 }
  0x2b   : > { %s2149_s27 = scalar_lea.hbm %s2148_s23, 4  ;;  %p2151_p9 = pneg %p2437_p8 }
  0x2c   : > { %p2150_p7 = scmp.ne.s32.totalorder %s2148_s23, %s2149_s27  ;;  %p2155_p0 = scmp.lt.s32.totalorder %s2148_s23, %s2799_s2 }
  0x2d   : > { %p2156_p2 = scmp.lt.s32.totalorder %s2154_s17, %s2149_s27 }
  0x2e   : > { %p2152_p10 = pnand %p2151_p9, %p2150_p7 }
  0x2f   : > { %p2157_p6 = por %p2156_p2, %p2155_p0 }
  0x30   : > { %p2153_p11 = pneg %p2152_p10 }
  0x32   : > { %p2158_p5 = pnand %p2157_p6, %p2153_p11 }
  0x34   : > { %2161 = shalt.err (!%p2158_p5)
}
  0x35   : > { %1942 = dma.hbm_to_vmem [thread:$0]  (!%p2437_p8), %s532_s28, 64, %s534_s9, %s522_s25  }
  0x36   : > { %542 = sbr.rel (%p2376_p3) target bundleno = 1172 (0x494), region = 84  ;;  %s2454_s21 = sand.u32 (!%p2376_p3), 1, %s2243_s24  }
  0x37   : > { %s1720_s15 = sshll.u32 (!%p2376_p3), %s2454_s21, 2  ;;  %s545_s10 = scalar_lea.sflag (!%p2376_p3), [#allocation4], %s2454_s21 }
  0x38   : > { %s2458_s19 = scalar_lea.vmem (!%p2376_p3), [#allocation3], %s1720_s15 }
  0x3b   : > { %2222 = dma.done.wait (%p2419_p12), %s545_s10, 64  }
  0x3c   : > { %2224 = vsyncadd (%p2419_p12), %s545_s10, 4294967232 }
  0x3d   : > { %2226 = dma.done.wait (%p109_p1), [#allocation7], 2048  }
  0x3e   : > { %2228 = vsyncadd (%p109_p1), [#allocation7], 4294965248 }
  0x3f   : > { %2230 = dma.done.wait (%p109_p1), [#allocation10], 1024  }
  0x40   : > { %2232 = vsyncadd (%p109_p1), [#allocation10], 4294966272  ;;  %v1888_v1 = vld [vmem:[%s2800_s3 + $0x38] sm:$0xff]  ;;  %v1887_v2 = vld [vmem:[%s2800_s3 + $0x30] sm:$0xff]  ;;  %s2485_s17 = sshll.u32 %s2371_s29, 3  ;;  %s2837_s0 = sld [smem:[#allocation21_spill]] }
  0x41   : > { %735 = vmatpush.bf16.msra.mxu0 %v1888_v1  ;;  %v1886_v3 = vld [vmem:[%s2800_s3 + $0x28] sm:$0xff]  ;;  %v1885_v4 = vld [vmem:[%s2800_s3 + $0x20] sm:$0xff]  ;;  %v1884_v5 = vld [vmem:[%s2800_s3 + $0x18] sm:$0xff]  ;;  %p624_p1 = scmp.lt.s32.totalorder %s2485_s17, 15  ;;  %s2197_s29 = scalar_lea.hbm %s2813_s16, 16 }
  0x42   : > { %v1883_v6 = vld [vmem:[%s2800_s3 + $0x10] sm:$0xff]  ;;  %v1882_v7 = vld [vmem:[%s2800_s3 + $0x8] sm:$0xff]  ;;  %v1881_v8 = vld [vmem:[%s2800_s3] sm:$0xff] }
  0x43   : > { %s2495_s9 = scalar_select %p624_p1, %s2485_s17, 15  ;;  %v1996_v13 = vld [vmem:[%s2801_s4] ss:$0 sm:$0xff]  ;;  %v1896_v38 = vld [vmem:[#allocation6 + $0x38] sm:$0xff]  ;;  %v1894_v47 = vld [vmem:[#allocation6 + $0x28] sm:$0xff] }
  0x44   : > { %1108 = vmatpush.bf16.msra.mxu1 %v1896_v38  ;;  %v1895_v44 = vld [vmem:[#allocation6 + $0x30] sm:$0xff]  ;;  %v1893_v53 = vld [vmem:[#allocation6 + $0x20] sm:$0xff]  ;;  %v1892_v57 = vld [vmem:[#allocation6 + $0x18] sm:$0xff] }
  0x45   : > { %736 = vmatpush.bf16.msra.mxu0 %v1887_v2  ;;  %s1726_s25 = sshll.u32 %s2495_s9, 2  ;;  %v1891_v1 = vld [vmem:[#allocation6 + $0x10] sm:$0xff]  ;;  %s1728_s30 = sshll.u32 %s2495_s9, 3 }
  0x46   : > { %s627_s18 = scalar_lea.vmem %s2837_s0, %s1726_s25  ;;  %s2653_s9 = scalar_lea.vmem %s2798_s1, %s1728_s30 }
  0x47   : > { %v1877_v9 = vld [vmem:[%s627_s18] sm:$0xff]  ;;  %v1878_v10 = vld [vmem:[%s627_s18 + $0x8] sm:$0xff]  ;;  %v1879_v11 = vld [vmem:[%s627_s18 + $0x10] sm:$0xff]  ;;  %s1724_s30 = sshll.u32 %s2454_s21, 3 }
  0x48   : > { %v1880_v12 = vld [vmem:[%s627_s18 + $0x18] sm:$0xff]  ;;  %1109 = vmatpush.bf16.msra.mxu1 %v1895_v44  ;;  %s622_s28 = scalar_lea.vmem [#allocation11], %s1724_s30  ;;  %s1573_s18 = scalar_lea.sflag [#allocation5], %s2454_s21 }
  0x49   : > { %737 = vmatpush.bf16.msra.mxu0 %v1886_v3  ;;  %s1585_s0 = sshll.u32 %s622_s28, 4  ;;  %s1586_s0 = int_to_ptr.vmem [resolvable:$true] %s1585_s0 }
  0x4c   : > { %1110 = vmatpush.bf16.msra.mxu1 %v1894_v47 }
  0x4d   : > { %738 = vmatpush.bf16.msra.mxu0 %v1885_v4 }
  0x50   : > { %1111 = vmatpush.bf16.msra.mxu1 %v1893_v53 }
  0x51   : > { %739 = vmatpush.bf16.msra.mxu0 %v1884_v5 }
  0x54   : > { %1112 = vmatpush.bf16.msra.mxu1 %v1892_v57 }
  0x55   : > { %740 = vmatpush.bf16.msra.mxu0 %v1883_v6 }
  0x58   : > { %1113 = vmatpush.bf16.msra.mxu1 %v1891_v1 }
  0x59   : > { %741 = vmatpush.bf16.msra.mxu0 %v1882_v7  ;;  %v1890_v7 = vld [vmem:[#allocation6 + $0x8] sm:$0xff] }
  0x5c   : > { %1114 = vmatpush.bf16.msra.mxu1 %v1890_v7 }
  0x5d   : > { %742 = vmatpush.bf16.msra.mxu0 %v1881_v8 }
  0x60   : > { %743 = vmatmul.bf16.vlgmr.msra.gmra.mxu0 %v1877_v9 }
  0x70   : > { %748 = vmatmul.bf16.gmra.mxu0 %v1878_v10 }
  0x80   : > { %753 = vmatmul.bf16.gmra.mxu0 %v1879_v11 }
  0x90   : > { %758 = vmatmul.bf16.gmra.mxu0 %v1880_v12  ;;  %v2562_v12 = vld [vmem:[%s2802_s5] ss:$0 sm:$0xff] }
  0xdd   : > { %v744_v14 = vpop.f32.mrf.mxu0 }
  0xde   : > { %v2510_v15 = vadd.f32 %v1996_v13, %v744_v14 }
  0xe0   : > { %766 = vadd.xlane.f32.xlu0 %v2510_v15  ;;  %v790_v16 = vmul.f32 %v2510_v15, %v2510_v15 }
  0xe2   : > { %798 = vadd.xlane.f32.xlu1 %v790_v16 }
  0xe5   : > { %v746_v17 = vpop.f32.mrf.mxu0 }
  0xe6   : > { %v2515_v18 = vadd.f32 %v1996_v13, %v746_v17 }
  0xe8   : > { %768 = vadd.xlane.f32.xlu0 %v2515_v18  ;;  %v791_v19 = vmul.f32 %v2515_v18, %v2515_v18 }
  0xea   : > { %800 = vadd.xlane.f32.xlu1 %v791_v19  ;;  %v2569_v19 = vld [vmem:[%s2803_s6] ss:$0 sm:$0xff] }
  0xed   : > { %v749_v20 = vpop.f32.mrf.mxu0 }
  0xee   : > { %v2520_v21 = vadd.f32 %v1996_v13, %v749_v20 }
  0xf0   : > { %770 = vadd.xlane.f32.xlu2 %v2520_v21  ;;  %v792_v22 = vmul.f32 %v2520_v21, %v2520_v21 }
  0xf2   : > { %802 = vadd.xlane.f32.xlu0 %v792_v22 }
  0xf5   : > { %v751_v23 = vpop.f32.mrf.mxu0 }
  0xf6   : > { %v2525_v24 = vadd.f32 %v1996_v13, %v751_v23  ;;  %v1889_v23 = vld [vmem:[#allocation6] sm:$0xff] }
  0xf7   : > { %1115 = vmatpush.bf16.msra.mxu1 %v1889_v23 }
  0xf8   : > { %772 = vadd.xlane.f32.xlu2 %v2525_v24  ;;  %v793_v25 = vmul.f32 %v2525_v24, %v2525_v24 }
  0xfa   : > { %804 = vadd.xlane.f32.xlu1 %v793_v25 }
  0xfd   : > { %v754_v26 = vpop.f32.mrf.mxu0 }
  0xfe   : > { %v2530_v27 = vadd.f32 %v1996_v13, %v754_v26 }
 0x100   : > { %774 = vadd.xlane.f32.xlu2 %v2530_v27  ;;  %v794_v28 = vmul.f32 %v2530_v27, %v2530_v27 }
 0x102   : > { %806 = vadd.xlane.f32.xlu1 %v794_v28 }
 0x105   : > { %v756_v29 = vpop.f32.mrf.mxu0 }
 0x106   : > { %v2535_v30 = vadd.f32 %v1996_v13, %v756_v29 }
 0x108   : > { %776 = vadd.xlane.f32.xlu0 %v2535_v30  ;;  %v795_v31 = vmul.f32 %v2535_v30, %v2535_v30 }
 0x10a   : > { %808 = vadd.xlane.f32.xlu2 %v795_v31 }
 0x10d   : > { %v759_v32 = vpop.f32.mrf.mxu0 }
 0x10e   : > { %v2540_v33 = vadd.f32 %v1996_v13, %v759_v32 }
 0x110   : > { %778 = vadd.xlane.f32.xlu0 %v2540_v33  ;;  %v796_v34 = vmul.f32 %v2540_v33, %v2540_v33 }
 0x112   : > { %810 = vadd.xlane.f32.xlu2 %v796_v34 }
 0x115   : > { %v761_v35 = vpop.f32.mrf.mxu0 }
 0x116   : > { %v2545_v36 = vadd.f32 %v1996_v13, %v761_v35 }
 0x118   : > { %780 = vadd.xlane.f32.xlu1 %v2545_v36  ;;  %v797_v37 = vmul.f32 %v2545_v36, %v2545_v36 }
 0x11a   : > { %812 = vadd.xlane.f32.xlu0 %v797_v37 }
 0x153   : > { %v767_v39 = vpop.xlane.xlu0 %766 }
 0x154   : > { %v782_v40 = vmul.f32 0.015625, %v767_v39 }
 0x155   : > { %v799_v41 = vpop.xlane.xlu1 %798 }
 0x156   : > { %v822_v42 = vmul.f32 %v782_v40, %v782_v40  ;;  %v814_v43 = vmul.f32 0.015625, %v799_v41  ;;  %v838_v11 = vsub.f32 %v2510_v15, %v782_v40 }
 0x158   : > { %v830_v45 = vsub.f32 %v814_v43, %v822_v42 }
 0x15a   : > { %v846_v46 = vadd.f32 1e-05, %v830_v45 }
 0x15b   : > { %v769_v48 = vpop.xlane.xlu0 %768 }
 0x15c   : > { %2005 = vrsqrt.f32 %v846_v46  ;;  %v2550_v49 = vmul.f32 0.015625, %v769_v48  ;;  %vm860_vm1 = vweird.f32 %v846_v46 }
 0x15d   : > { %v801_v50 = vpop.xlane.xlu1 %800 }
 0x15e   : > { %v823_v51 = vmul.f32 %v2550_v49, %v2550_v49  ;;  %v815_v52 = vmul.f32 0.015625, %v801_v50  ;;  %v839_v39 = vsub.f32 %v2515_v18, %v2550_v49 }
 0x160   : > { %v831_v54 = vsub.f32 %v815_v52, %v823_v51 }
 0x162   : > { %v2006_v55 = vpop.eup %2005  ;;  %v847_v56 = vadd.f32 1e-05, %v831_v54 }
 0x163   : > { %v855_v58 = vmul.f32 %v2006_v55, %v846_v46  ;;  %v771_v59 = vpop.xlane.xlu2 %770  ;;  %vm861_vm0 = vweird.f32 %v2006_v55 }
 0x164   : > { %2007 = vrsqrt.f32 %v847_v56  ;;  %v2554_v60 = vmul.f32 0.015625, %v771_v59  ;;  %vm862_vm2 = vmor %vm860_vm1, %vm861_vm0  ;;  %vm870_vm4 = vweird.f32 %v847_v56 }
 0x165   : > { %v856_v61 = vmul.f32 %v2006_v55, %v855_v58  ;;  %v803_v62 = vpop.xlane.xlu0 %802 }
 0x166   : > { %v824_v63 = vmul.f32 %v2554_v60, %v2554_v60  ;;  %v816_v0 = vmul.f32 0.015625, %v803_v62 }
 0x167   : > { %v857_v2 = vmul.f32 0.5, %v856_v61  ;;  %v840_v61 = vsub.f32 %v2520_v21, %v2554_v60 }
 0x168   : > { %v832_v3 = vsub.f32 %v816_v0, %v824_v63 }
 0x169   : > { %v858_v4 = vsub.f32 1.5, %v857_v2 }
 0x16a   : > { %v2008_v5 = vpop.eup %2007  ;;  %v848_v6 = vadd.f32 1e-05, %v832_v3 }
 0x16b   : > { %v859_v8 = vmul.f32 %v2006_v55, %v858_v4  ;;  %v865_v9 = vmul.f32 %v2008_v5, %v847_v56  ;;  %v773_v10 = vpop.xlane.xlu2 %772  ;;  %vm871_vm3 = vweird.f32 %v2008_v5 }
 0x16c   : > { %2009 = vrsqrt.f32 %v848_v6  ;;  %v2564_v13 = vmul.f32 0.015625, %v773_v10  ;;  %vm872_vm5 = vmor %vm870_vm4, %vm871_vm3  ;;  %vm880_vm7 = vweird.f32 %v848_v6 }
 0x16d   : > { %v863_v14 = vsel %vm862_vm2, %v2006_v55, %v859_v8  ;;  %v866_v16 = vmul.f32 %v2008_v5, %v865_v9  ;;  %v805_v17 = vpop.xlane.xlu1 %804 }
 0x16e   : > { %v934_v20 = vmul.f32 %v863_v14, %v838_v11  ;;  %v825_v15 = vmul.f32 %v2564_v13, %v2564_v13  ;;  %v817_v22 = vmul.f32 0.015625, %v805_v17  ;;  %v841_v23 = vsub.f32 %v2525_v24, %v2564_v13 }
 0x16f   : > { %v867_v25 = vmul.f32 0.5, %v866_v16 }
 0x170   : > { %v945_v26 = vmul.f32 %v2562_v12, %v934_v20  ;;  %v833_v28 = vsub.f32 %v817_v22, %v825_v15 }
 0x171   : > { %v868_v29 = vsub.f32 1.5, %v867_v25 }
 0x172   : > { %v2010_v31 = vpop.eup %2009  ;;  %v2575_v32 = vadd.f32 %v2569_v19, %v945_v26  ;;  %v849_v34 = vadd.f32 1e-05, %v833_v28 }
 0x173   : > { %v869_v35 = vmul.f32 %v2008_v5, %v868_v29  ;;  %v875_v37 = vmul.f32 %v2010_v31, %v848_v6  ;;  %v775_v38 = vpop.xlane.xlu2 %774  ;;  %vm881_vm6 = vweird.f32 %v2010_v31 }
 0x174   : > { %2011 = vrsqrt.f32 %v849_v34  ;;  %v2579_v40 = vmul.f32 0.015625, %v775_v38  ;;  %v972_v44 = vmul.f32 0.044715, %v2575_v32  ;;  %vm882_vm8 = vmor %vm880_vm7, %vm881_vm6  ;;  %vm890_vm10 = vweird.f32 %v849_v34 }
 0x175   : > { %v873_v41 = vsel %vm872_vm5, %v2008_v5, %v869_v35  ;;  %v876_v42 = vmul.f32 %v2010_v31, %v875_v37  ;;  %v807_v43 = vpop.xlane.xlu1 %806 }
 0x176   : > { %v935_v45 = vmul.f32 %v873_v41, %v839_v39  ;;  %v826_v46 = vmul.f32 %v2579_v40, %v2579_v40  ;;  %v818_v47 = vmul.f32 0.015625, %v807_v43  ;;  %v980_v50 = vmul.f32 %v972_v44, %v2575_v32 }
 0x177   : > { %v877_v48 = vmul.f32 0.5, %v876_v42 }
 0x178   : > { %v946_v51 = vmul.f32 %v2562_v12, %v935_v45  ;;  %v834_v18 = vsub.f32 %v818_v47, %v826_v46  ;;  %v988_v52 = vmul.f32 %v980_v50, %v2575_v32 }
 0x179   : > { %v878_v49 = vsub.f32 1.5, %v877_v48 }
 0x17a   : > { %v2012_v53 = vpop.eup %2011  ;;  %v2588_v54 = vadd.f32 %v2569_v19, %v946_v51  ;;  %v2590_v55 = vadd.f32 1e-05, %v834_v18  ;;  %v996_v59 = vadd.f32 %v988_v52, %v2575_v32 }
 0x17b   : > { %v879_v56 = vmul.f32 %v2010_v31, %v878_v49  ;;  %v885_v57 = vmul.f32 %v2012_v53, %v849_v34  ;;  %v777_v58 = vpop.xlane.xlu0 %776  ;;  %vm891_vm9 = vweird.f32 %v2012_v53  ;;  %v842_v49 = vsub.f32 %v2530_v27, %v2579_v40 }
 0x17c   : > { %2013 = vrsqrt.f32 %v2590_v55  ;;  %v2596_v62 = vmul.f32 0.015625, %v777_v58  ;;  %v973_v2 = vmul.f32 0.044715, %v2588_v54  ;;  %v1004_v8 = vmul.f32 0.7978846, %v996_v59  ;;  %vm892_vm11 = vmor %vm890_vm10, %vm891_vm9 }
 0x17d   : > { %v883_v63 = vsel %vm882_vm8, %v2010_v31, %v879_v56  ;;  %v886_v0 = vmul.f32 %v2012_v53, %v885_v57  ;;  %v809_v1 = vpop.xlane.xlu2 %808  ;;  %vm900_vm13 = vweird.f32 %v2590_v55  ;;  %v965_v40 = vmul.f32 0.5, %v2588_v54 }
 0x17e   : > { %v936_v3 = vmul.f32 %v883_v63, %v840_v61  ;;  %v827_v4 = vmul.f32 %v2596_v62, %v2596_v62  ;;  %v819_v5 = vmul.f32 0.015625, %v809_v1  ;;  %v981_v7 = vmul.f32 %v973_v2, %v2588_v54 }
 0x17f   : > { %v887_v6 = vmul.f32 0.5, %v886_v0  ;;  %2015 = vtanh.f32 %v1004_v8  ;;  %vm1370_vm8 = vcmask 1041409   ;;  %vm1372_vm9 = vcmask 1042434  }
 0x180   : > { %v947_v21 = vmul.f32 %v2562_v12, %v936_v3  ;;  %v835_v60 = vsub.f32 %v819_v5, %v827_v4  ;;  %v989_v10 = vmul.f32 %v981_v7, %v2588_v54  ;;  %vm1374_vm10 = vcmask 1043459  }
 0x181   : > { %v888_v9 = vsub.f32 1.5, %v887_v6 }
 0x182   : > { %v2014_v11 = vpop.eup %2013  ;;  %v2605_v14 = vadd.f32 %v2569_v19, %v947_v21  ;;  %v2607_v16 = vadd.f32 1e-05, %v835_v60  ;;  %v997_v22 = vadd.f32 %v989_v10, %v2588_v54 }
 0x183   : > { %v889_v17 = vmul.f32 %v2012_v53, %v888_v9  ;;  %v895_v20 = vmul.f32 %v2014_v11, %v2590_v55  ;;  %v779_v15 = vpop.xlane.xlu0 %778  ;;  %vm901_vm12 = vweird.f32 %v2014_v11  ;;  %v964_v55 = vmul.f32 0.5, %v2575_v32 }
 0x184   : > { %2017 = vrsqrt.f32 %v2607_v16  ;;  %v2614_v25 = vmul.f32 0.015625, %v779_v15  ;;  %v1005_v31 = vmul.f32 0.7978846, %v997_v22  ;;  %v974_v34 = vmul.f32 0.044715, %v2605_v14  ;;  %vm902_vm14 = vmor %vm900_vm13, %vm901_vm12 }
 0x185   : > { %v893_v26 = vsel %vm892_vm11, %v2012_v53, %v889_v17  ;;  %v896_v28 = vmul.f32 %v2014_v11, %v895_v20  ;;  %v811_v29 = vpop.xlane.xlu2 %810  ;;  %v2016_v42 = vpop.eup %2015  ;;  %vm910_vm0 = vweird.f32 %v2607_v16  ;;  %v843_v20 = vsub.f32 %v2535_v30, %v2596_v62 }
 0x186   : > { %v937_v35 = vmul.f32 %v893_v26, %v841_v23  ;;  %v828_v37 = vmul.f32 %v2614_v25, %v2614_v25  ;;  %v820_v38 = vmul.f32 0.015625, %v811_v29  ;;  %2019 = vtanh.f32 %v1005_v31  ;;  %v1209_v26 = vld [vmem:[%s2653_s9] sm:$0xff] }
 0x187   : > { %v897_v39 = vmul.f32 0.5, %v896_v28  ;;  %v982_v24 = vmul.f32 %v974_v34, %v2605_v14  ;;  %v1020_v53 = vadd.f32 1.0, %v2016_v42  ;;  %v2258_v31 = vmov 0  }
 0x188   : > { %v948_v13 = vmul.f32 %v2562_v12, %v937_v35  ;;  %v836_v41 = vsub.f32 %v820_v38, %v828_v37  ;;  %1993 = vset.pattern.permute.xlu1 %v2258_v31  ;;  %1995 = vset.pattern.permute.xlu0 %v2258_v31  ;;  %vm1376_vm11 = vcmask 1044484   ;;  %vm1378_vm12 = vcmask 1045509  }
 0x189   : > { %v898_v43 = vsub.f32 1.5, %v897_v39  ;;  %v990_v44 = vmul.f32 %v982_v24, %v2605_v14  ;;  %v1028_v7 = vmul.f32 %v1020_v53, %v964_v55  ;;  %1219 = vperm.xlu1 %1993, %v1209_v26   ;;  %1994 = vset.pattern.permute.xlu2 %v2258_v31  ;;  %vm1380_vm13 = vcmask 1046534  }
 0x18a   : > { %v2018_v45 = vpop.eup %2017  ;;  %v2623_v46 = vadd.f32 %v2569_v19, %v948_v13  ;;  %v2625_v47 = vadd.f32 1e-05, %v836_v41 }
 0x18b   : > { %v899_v48 = vmul.f32 %v2014_v11, %v898_v43  ;;  %v905_v50 = vmul.f32 %v2018_v45, %v2607_v16  ;;  %v781_v51 = vpop.xlane.xlu1 %780  ;;  %v998_v18 = vadd.f32 %v990_v44, %v2605_v14  ;;  %vm911_vm15 = vweird.f32 %v2018_v45 }
 0x18c   : > { %2021 = vrsqrt.f32 %v2625_v47  ;;  %v2633_v52 = vmul.f32 0.015625, %v781_v51  ;;  %v2020_v56 = vpop.eup %2019  ;;  %v975_v61 = vmul.f32 0.044715, %v2623_v46  ;;  %vm912_vm1 = vmor %vm910_vm0, %vm911_vm15  ;;  %vm920_vm3 = vweird.f32 %v2625_v47 }
 0x18d   : > { %v903_v57 = vsel %vm902_vm14, %v2014_v11, %v899_v48  ;;  %v906_v58 = vmul.f32 %v2018_v45, %v905_v50  ;;  %v813_v59 = vpop.xlane.xlu0 %812  ;;  %v1021_v2 = vadd.f32 1.0, %v2020_v56  ;;  %v1006_v4 = vmul.f32 0.7978846, %v998_v18 }
 0x18e   : > { %v938_v63 = vmul.f32 %v903_v57, %v842_v49  ;;  %v829_v0 = vmul.f32 %v2633_v52, %v2633_v52  ;;  %v821_v27 = vmul.f32 0.015625, %v813_v59  ;;  %v983_v3 = vmul.f32 %v975_v61, %v2623_v46 }
 0x18f   : > { %v907_v1 = vmul.f32 0.5, %v906_v58  ;;  %v1029_v8 = vmul.f32 %v1021_v2, %v965_v40  ;;  %2023 = vtanh.f32 %v1006_v4  ;;  %v844_v43 = vsub.f32 %v2540_v33, %v2614_v25  ;;  %v1213_v4 = vld [vmem:[%s2653_s9 + $0x20] sm:$0xff] }
 0x190   : > { %v949_v5 = vmul.f32 %v2562_v12, %v938_v63  ;;  %v837_v6 = vsub.f32 %v821_v27, %v829_v0  ;;  %v991_v21 = vmul.f32 %v983_v3, %v2623_v46  ;;  %v966_v57 = vmul.f32 0.5, %v2605_v14  ;;  %v1211_v3 = vld [vmem:[%s2653_s9 + $0x10] sm:$0xff] }
 0x191   : > { %v908_v32 = vsub.f32 1.5, %v907_v1  ;;  %v1036_v17 = vpack.c.bf16 %v1029_v8, %v1028_v7  ;;  %1229 = vperm.xlu0 %1995, %v1211_v3   ;;  %1239 = vperm.xlu1 %1993, %v1213_v4   ;;  %vm1382_vm14 = vcmask 1047559  }
 0x192   : > { %v2022_v60 = vpop.eup %2021  ;;  %v2645_v9 = vadd.f32 %v2569_v19, %v949_v5  ;;  %v2648_v54 = vadd.f32 1e-05, %v837_v6  ;;  %v999_v16 = vadd.f32 %v991_v21, %v2623_v46  ;;  %v1210_v5 = vld [vmem:[%s2653_s9 + $0x8] sm:$0xff] }
 0x193   : > { %v909_v10 = vmul.f32 %v2018_v45, %v908_v32  ;;  %v915_v11 = vmul.f32 %v2022_v60, %v2625_v47  ;;  %1116 = vmatmul.bf16.vlgmr.msra.gmra.mxu1 %v1036_v17  ;;  %vm921_vm2 = vweird.f32 %v2022_v60  ;;  %v967_v47 = vmul.f32 0.5, %v2623_v46  ;;  %1224 = vperm.xlu2 %1994, %v1210_v5   ;;  %v1212_v17 = vld [vmem:[%s2653_s9 + $0x18] sm:$0xff] }
 0x194   : > { %2025 = vrsqrt.f32 %v2648_v54  ;;  %v976_v23 = vmul.f32 0.044715, %v2645_v9  ;;  %v1007_v29 = vmul.f32 0.7978846, %v999_v16  ;;  %vm922_vm4 = vmor %vm920_vm3, %vm921_vm2  ;;  %vm930_vm6 = vweird.f32 %v2648_v54 }
 0x195   : > { %v913_v15 = vsel %vm912_vm1, %v2018_v45, %v909_v10  ;;  %v916_v22 = vmul.f32 %v2022_v60, %v915_v11  ;;  %v2024_v62 = vpop.eup %2023  ;;  %v845_v46 = vsub.f32 %v2545_v36, %v2633_v52 }
 0x196   : > { %v939_v28 = vmul.f32 %v913_v15, %v843_v20  ;;  %v984_v35 = vmul.f32 %v976_v23, %v2645_v9  ;;  %2027 = vtanh.f32 %v1007_v29  ;;  %v1022_v50 = vadd.f32 1.0, %v2024_v62  ;;  %v1216_v62 = vld [vmem:[%s2653_s9 + $0x38] sm:$0xff] }
 0x197   : > { %v917_v34 = vmul.f32 0.5, %v916_v22  ;;  %v968_v20 = vmul.f32 0.5, %v2645_v9 }
 0x198   : > { %v950_v30 = vmul.f32 %v2562_v12, %v939_v28  ;;  %v992_v38 = vmul.f32 %v984_v35, %v2645_v9  ;;  %v1030_v33 = vmul.f32 %v1022_v50, %v966_v57 }
 0x199   : > { %v918_v37 = vsub.f32 1.5, %v917_v34  ;;  %v1214_v34 = vld [vmem:[%s2653_s9 + $0x28] sm:$0xff] }
 0x19a   : > { %v2026_v39 = vpop.eup %2025  ;;  %v961_v24 = vadd.f32 %v2569_v19, %v950_v30  ;;  %v1000_v42 = vadd.f32 %v992_v38, %v2645_v9 }
 0x19b   : > { %v919_v13 = vmul.f32 %v2022_v60, %v918_v37  ;;  %v925_v41 = vmul.f32 %v2026_v39, %v2648_v54  ;;  %vm931_vm5 = vweird.f32 %v2026_v39  ;;  %v1215_v54 = vld [vmem:[%s2653_s9 + $0x30] sm:$0xff]  ;;  %1234 = vperm.xlu2 %1994, %v1212_v17   ;;  %s1583_s9 = scalar_lea.hbm %s2813_s16, %s2485_s17 }
 0x19c   : > { %v977_v44 = vmul.f32 0.044715, %v961_v24  ;;  %v2028_v51 = vpop.eup %2027  ;;  %v1008_v53 = vmul.f32 0.7978846, %v1000_v42  ;;  %vm932_vm7 = vmor %vm930_vm6, %vm931_vm5  ;;  %v969_v16 = vmul.f32 0.5, %v961_v24  ;;  %1249 = vperm.xlu1 %1993, %v1215_v54  }
 0x19d   : > { %v923_v45 = vsel %vm922_vm4, %v2022_v60, %v919_v13  ;;  %v926_v48 = vmul.f32 %v2026_v39, %v925_v41  ;;  %v1023_v58 = vadd.f32 1.0, %v2028_v51 }
 0x19e   : > { %v940_v18 = vmul.f32 %v923_v45, %v844_v43  ;;  %v985_v49 = vmul.f32 %v977_v44, %v961_v24  ;;  %2029 = vtanh.f32 %v1008_v53  ;;  %v2691_v44 = vld [vmem:[%s2805_s8] ss:$0 sm:$0xff] }
 0x19f   : > { %v927_v56 = vmul.f32 0.5, %v926_v48  ;;  %v1031_v25 = vmul.f32 %v1023_v58, %v967_v47 }
 0x1a0   : > { %v951_v59 = vmul.f32 %v2562_v12, %v940_v18  ;;  %v993_v55 = vmul.f32 %v985_v49, %v961_v24 }
 0x1a1   : > { %v928_v61 = vsub.f32 1.5, %v927_v56  ;;  %v1037_v14 = vpack.c.bf16 %v1031_v25, %v1030_v33 }
 0x1a2   : > { %v962_v63 = vadd.f32 %v2569_v19, %v951_v59  ;;  %v1001_v0 = vadd.f32 %v993_v55, %v961_v24 }
 0x1a3   : > { %v929_v27 = vmul.f32 %v2026_v39, %v928_v61  ;;  %1121 = vmatmul.bf16.gmra.mxu1 %v1037_v14  ;;  %1244 = vperm.xlu2 %1994, %v1214_v34  }
 0x1a4   : > { %v1009_v40 = vmul.f32 0.7978846, %v1001_v0  ;;  %v978_v1 = vmul.f32 0.044715, %v962_v63  ;;  %v2030_v32 = vpop.eup %2029  ;;  %v970_v37 = vmul.f32 0.5, %v962_v63 }
 0x1a5   : > { %v933_v2 = vsel %vm932_vm7, %v2026_v39, %v929_v27  ;;  %v1024_v60 = vadd.f32 1.0, %v2030_v32 }
 0x1a6   : > { %v941_v6 = vmul.f32 %v933_v2, %v845_v46  ;;  %2031 = vtanh.f32 %v1009_v40  ;;  %v986_v7 = vmul.f32 %v978_v1, %v962_v63  ;;  %v1903_v2 = vld [vmem:[#allocation8 + $0x30] sm:$0xff] }
 0x1a7   : > { %v1032_v26 = vmul.f32 %v1024_v60, %v968_v20 }
 0x1a8   : > { %v952_v8 = vmul.f32 %v2562_v12, %v941_v6  ;;  %v994_v36 = vmul.f32 %v986_v7, %v962_v63 }
 0x1aa   : > { %v963_v52 = vadd.f32 %v2569_v19, %v952_v8  ;;  %v1002_v21 = vadd.f32 %v994_v36, %v962_v63  ;;  %v1904_v63 = vld [vmem:[#allocation8 + $0x38] sm:$0xff]  ;;  %v1902_v36 = vld [vmem:[#allocation8 + $0x28] sm:$0xff] }
 0x1ab   : > { %1254 = vperm.xlu2 %1994, %v1216_v62   ;;  %1495 = vmatpush.bf16.msra.mxu3 %v1904_v63  ;;  %v1912_v8 = vld [vmem:[#allocation9 + $0x38] sm:$0xff]  ;;  %v1909_v62 = vld [vmem:[#allocation9 + $0x20] sm:$0xff] }
 0x1ac   : > { %v2032_v10 = vpop.eup %2031  ;;  %v979_v11 = vmul.f32 0.044715, %v963_v52  ;;  %v1010_v23 = vmul.f32 0.7978846, %v1002_v21  ;;  %v971_v38 = vmul.f32 0.5, %v963_v52  ;;  %1434 = vmatpush.bf16.msra.mxu2 %v1912_v8 }
 0x1ad   : > { %v1025_v15 = vadd.f32 1.0, %v2032_v10  ;;  %v1911_v10 = vld [vmem:[#allocation9 + $0x30] sm:$0xff] }
 0x1ae   : > { %v987_v22 = vmul.f32 %v979_v11, %v963_v52  ;;  %2033 = vtanh.f32 %v1010_v23  ;;  %v1901_v11 = vld [vmem:[#allocation8 + $0x20] sm:$0xff] }
 0x1af   : > { %v1033_v12 = vmul.f32 %v1025_v15, %v969_v16  ;;  %1496 = vmatpush.bf16.msra.mxu3 %v1903_v2 }
 0x1b0   : > { %v995_v28 = vmul.f32 %v987_v22, %v963_v52  ;;  %1435 = vmatpush.bf16.msra.mxu2 %v1911_v10 }
 0x1b1   : > { %v1038_v19 = vpack.c.bf16 %v1033_v12, %v1032_v26  ;;  %v1910_v26 = vld [vmem:[#allocation9 + $0x28] sm:$0xff]  ;;  %v1900_v12 = vld [vmem:[#allocation8 + $0x18] sm:$0xff] }
 0x1b2   : > { %v1003_v29 = vadd.f32 %v995_v28, %v963_v52 }
 0x1b3   : > { %1126 = vmatmul.bf16.gmra.mxu1 %v1038_v19  ;;  %1497 = vmatpush.bf16.msra.mxu3 %v1902_v36 }
 0x1b4   : > { %v1011_v31 = vmul.f32 0.7978846, %v1003_v29  ;;  %v2034_v35 = vpop.eup %2033  ;;  %1436 = vmatpush.bf16.msra.mxu2 %v1910_v26 }
 0x1b5   : > { %v1026_v9 = vadd.f32 1.0, %v2034_v35 }
 0x1b6   : > { %2035 = vtanh.f32 %v1011_v31 }
 0x1b7   : > { %v1034_v24 = vmul.f32 %v1026_v9, %v970_v37  ;;  %1498 = vmatpush.bf16.msra.mxu3 %v1901_v11  ;;  %v1899_v37 = vld [vmem:[#allocation8 + $0x10] sm:$0xff] }
 0x1b8   : > { %1437 = vmatpush.bf16.msra.mxu2 %v1909_v62 }
 0x1bb   : > { %1499 = vmatpush.bf16.msra.mxu3 %v1900_v12 }
 0x1bc   : > { %v2036_v30 = vpop.eup %2035 }
 0x1bd   : > { %v1027_v39 = vadd.f32 1.0, %v2036_v30 }
 0x1bf   : > { %v1035_v13 = vmul.f32 %v1027_v39, %v971_v38  ;;  %1500 = vmatpush.bf16.msra.mxu3 %v1899_v37 }
 0x1c1   : > { %v1039_v41 = vpack.c.bf16 %v1035_v13, %v1034_v24 }
 0x1c3   : > { %1131 = vmatmul.bf16.gmra.mxu1 %v1039_v41 }
 0x1ed   : > { %v1225_v16 = vpop.permute.xlu2 %1224 }
 0x1fb   : > { %v1220_v9 = vpop.permute.xlu1 %1219 }
 0x210   : > { %v1117_v42 = vpop.f32.mrf.mxu1 }
 0x211   : > { %v2697_v48 = vadd.f32 %v2691_v44, %v1117_v42 }
 0x213   : > { %v1145_v49 = vmul.f32 0.044715, %v2697_v48 }
 0x215   : > { %v1153_v57 = vmul.f32 %v1145_v49, %v2697_v48 }
 0x217   : > { %v1161_v61 = vmul.f32 %v1153_v57, %v2697_v48 }
 0x218   : > { %v1119_v43 = vpop.f32.mrf.mxu1 }
 0x219   : > { %v2694_v45 = vadd.f32 %v2691_v44, %v1119_v43  ;;  %v1169_v14 = vadd.f32 %v1161_v61, %v2697_v48 }
 0x21b   : > { %v1146_v18 = vmul.f32 0.044715, %v2694_v45  ;;  %v1177_v6 = vmul.f32 0.7978846, %v1169_v14  ;;  %v1138_v38 = vmul.f32 0.5, %v2694_v45  ;;  %v1240_v14 = vpop.permute.xlu1 %1239 }
 0x21d   : > { %v1154_v56 = vmul.f32 %v1146_v18, %v2694_v45 }
 0x21f   : > { %v1162_v55 = vmul.f32 %v1154_v56, %v2694_v45  ;;  %v1137_v56 = vmul.f32 0.5, %v2697_v48 }
 0x220   : > { %v1122_v50 = vpop.f32.mrf.mxu1 }
 0x221   : > { %v2700_v51 = vadd.f32 %v2691_v44, %v1122_v50  ;;  %v1170_v27 = vadd.f32 %v1162_v55, %v2694_v45  ;;  %v1235_v55 = vpop.permute.xlu2 %1234 }
 0x223   : > { %v1147_v53 = vmul.f32 0.044715, %v2700_v51  ;;  %v1178_v5 = vmul.f32 0.7978846, %v1170_v27  ;;  %v1139_v18 = vmul.f32 0.5, %v2700_v51 }
 0x225   : > { %v1155_v58 = vmul.f32 %v1147_v53, %v2700_v51  ;;  %2037 = vtanh.f32 %v1178_v5 }
 0x226   : > { %2039 = vtanh.f32 %v1177_v6 }
 0x227   : > { %v1163_v25 = vmul.f32 %v1155_v58, %v2700_v51  ;;  %v1898_v58 = vld [vmem:[#allocation8 + $0x8] sm:$0xff] }
 0x228   : > { %v1124_v47 = vpop.f32.mrf.mxu1  ;;  %1501 = vmatpush.bf16.msra.mxu3 %v1898_v58 }
 0x229   : > { %v2709_v59 = vadd.f32 %v2691_v44, %v1124_v47  ;;  %v1171_v1 = vadd.f32 %v1163_v25, %v2700_v51  ;;  %v1908_v47 = vld [vmem:[#allocation9 + $0x18] sm:$0xff]  ;;  %v1230_v51 = vpop.permute.xlu0 %1229  ;;  %v1245_v26 = vpop.permute.xlu2 %1244 }
 0x22a   : > { %1438 = vmatpush.bf16.msra.mxu2 %v1908_v47 }
 0x22b   : > { %v1148_v33 = vmul.f32 0.044715, %v2709_v59  ;;  %v1179_v32 = vmul.f32 0.7978846, %v1171_v1  ;;  %v2038_v23 = vpop.eup %2037  ;;  %v1140_v45 = vmul.f32 0.5, %v2709_v59  ;;  %v1897_v1 = vld [vmem:[#allocation8] sm:$0xff] }
 0x22c   : > { %v2040_v28 = vpop.eup %2039  ;;  %v1194_v34 = vadd.f32 1.0, %v2038_v23  ;;  %1502 = vmatpush.bf16.msra.mxu3 %v1897_v1 }
 0x22d   : > { %v1156_v0 = vmul.f32 %v1148_v33, %v2709_v59  ;;  %2041 = vtanh.f32 %v1179_v32  ;;  %v1193_v41 = vadd.f32 1.0, %v2040_v28  ;;  %v1906_v32 = vld [vmem:[#allocation9 + $0x8] sm:$0xff] }
 0x22e   : > { %v1202_v50 = vmul.f32 %v1194_v34, %v1138_v38 }
 0x22f   : > { %v1164_v46 = vmul.f32 %v1156_v0, %v2709_v59  ;;  %v1201_v63 = vmul.f32 %v1193_v41, %v1137_v56 }
 0x230   : > { %v1127_v40 = vpop.f32.mrf.mxu1  ;;  %v1258_v27 = vmul.f32 %v1225_v16, %v1202_v50 }
 0x231   : > { %v2721_v3 = vadd.f32 %v2691_v44, %v1127_v40  ;;  %v1172_v4 = vadd.f32 %v1164_v46, %v2709_v59  ;;  %v1907_v40 = vld [vmem:[#allocation9 + $0x10] sm:$0xff]  ;;  %v1257_v5 = vmul.f32 %v1220_v9, %v1201_v63  ;;  %v1255_v1 = vpop.permute.xlu2 %1254 }
 0x232   : > { %1439 = vmatpush.bf16.msra.mxu2 %v1907_v40  ;;  %v1271_v36 = vrot.slane %v1258_v27, 4 }
 0x233   : > { %v1149_v7 = vmul.f32 0.044715, %v2721_v3  ;;  %v1180_v52 = vmul.f32 0.7978846, %v1172_v4  ;;  %v2042_v29 = vpop.eup %2041  ;;  %v1141_v33 = vmul.f32 0.5, %v2721_v3 }
 0x234   : > { %v1195_v39 = vadd.f32 1.0, %v2042_v29  ;;  %v1272_v23 = vadd.f32 %v1271_v36, %v1258_v27 }
 0x235   : > { %v1157_v21 = vmul.f32 %v1149_v7, %v2721_v3  ;;  %2043 = vtanh.f32 %v1180_v52  ;;  %v1313_v7 = vld [vmem:[%s2458_s19] sm:$0xf]  ;;  %s1587_s19 = sshll.u32 %s1583_s9, 4  ;;  %s1588_s19 = int_to_ptr.hbm [resolvable:$true] %s1587_s19 }
 0x236   : > { %v1203_v61 = vmul.f32 %v1195_v39, %v1139_v18  ;;  %1503 = vmatmul.bf16.vlgmr.msra.gmra.mxu3 %v1313_v7  ;;  %1440 = vmatpush.bf16.msra.mxu2 %v1906_v32  ;;  %s2191_s22 = sshra.s32 %s1588_s19, 4  ;;  %s2192_s22 = int_to_ptr.hbm [resolvable:$true] %s2191_s22 }
 0x237   : > { %v1165_v60 = vmul.f32 %v1157_v21, %v2721_v3  ;;  %s2193_s15 = scalar_lea.hbm %s2192_s22, 8  ;;  %p2198_p8 = scmp.lt.s32.totalorder %s2192_s22, %s2813_s16 }
 0x238   : > { %v1129_v54 = vpop.f32.mrf.mxu1  ;;  %v1259_v2 = vmul.f32 %v1230_v51, %v1203_v61  ;;  %p2194_p3 = scmp.ne.s32.totalorder %s2192_s22, %s2193_s15  ;;  %p2199_p7 = scmp.lt.s32.totalorder %s2197_s29, %s2193_s15 }
 0x239   : > { %v2728_v17 = vadd.f32 %v2691_v44, %v1129_v54  ;;  %v1173_v20 = vadd.f32 %v1165_v60, %v2721_v3 }
 0x23a   : > { %v1277_v11 = vrot.slane %v1259_v2, 4  ;;  %p2195_p5 = pnand %p2194_p3, %p2423_p13  ;;  %p2200_p9 = por %p2199_p7, %p2198_p8 }
 0x23b   : > { %v1150_v15 = vmul.f32 0.044715, %v2728_v17  ;;  %v1181_v22 = vmul.f32 0.7978846, %v1173_v20  ;;  %v2044_v31 = vpop.eup %2043  ;;  %v1142_v54 = vmul.f32 0.5, %v2728_v17 }
 0x23c   : > { %v1196_v42 = vadd.f32 1.0, %v2044_v31  ;;  %v1278_v29 = vadd.f32 %v1277_v11, %v1259_v2  ;;  %p2196_p12 = pneg %p2195_p5 }
 0x23d   : > { %v1158_v19 = vmul.f32 %v1150_v15, %v2728_v17  ;;  %2045 = vtanh.f32 %v1181_v22  ;;  %v1905_v22 = vld [vmem:[#allocation9] sm:$0xff] }
 0x23e   : > { %v1204_v0 = vmul.f32 %v1196_v42, %v1140_v45  ;;  %1441 = vmatpush.bf16.msra.mxu2 %v1905_v22  ;;  %v1279_v41 = vrot.slane %v1278_v29, 2  ;;  %p2201_p10 = pnand %p2200_p9, %p2196_p12 }
 0x23f   : > { %v1166_v35 = vmul.f32 %v1158_v19, %v2728_v17 }
 0x240   : > { %v1132_v30 = vpop.f32.mrf.mxu1  ;;  %v1260_v6 = vmul.f32 %v1235_v55, %v1204_v0 }
 0x241   : > { %v1174_v24 = vadd.f32 %v1166_v35, %v2728_v17  ;;  %v2737_v13 = vadd.f32 %v2691_v44, %v1132_v30  ;;  %v1273_v30 = vrot.slane %v1272_v23, 2 }
 0x242   : > { %v1283_v16 = vrot.slane %v1260_v6, 4 }
 0x243   : > { %v2046_v43 = vpop.eup %2045  ;;  %v1182_v49 = vmul.f32 0.7978846, %v1174_v24  ;;  %v1151_v53 = vmul.f32 0.044715, %v2737_v13  ;;  %v1143_v39 = vmul.f32 0.5, %v2737_v13  ;;  %v1274_v18 = vadd.f32 %v1273_v30, %v1272_v23 }
 0x244   : > { %v1197_v57 = vadd.f32 1.0, %v2046_v43  ;;  %v1284_v35 = vadd.f32 %v1283_v16, %v1260_v6 }
 0x245   : > { %2047 = vtanh.f32 %v1182_v49  ;;  %v1159_v25 = vmul.f32 %v1151_v53, %v2737_v13  ;;  %v1250_v53 = vpop.permute.xlu1 %1249 }
 0x246   : > { %v1205_v48 = vmul.f32 %v1197_v57, %v1141_v33  ;;  %v1285_v43 = vrot.slane %v1284_v35, 2  ;;  %v1280_v57 = vadd.f32 %v1279_v41, %v1278_v29  ;;  %v1275_v33 = vrot.slane %v1274_v18, 1 }
 0x247   : > { %v1167_v59 = vmul.f32 %v1159_v25, %v2737_v13 }
 0x248   : > { %v1134_v46 = vpop.f32.mrf.mxu1  ;;  %v1261_v52 = vmul.f32 %v1240_v14, %v1205_v48  ;;  %v1286_v58 = vadd.f32 %v1285_v43, %v1284_v35  ;;  %v1281_v27 = vrot.slane %v1280_v57, 1  ;;  %v1276_v2 = vadd.f32 %v1275_v33, %v1274_v18 }
 0x249   : > { %v1135_v4 = vadd.f32 %v2691_v44, %v1134_v46  ;;  %v1175_v3 = vadd.f32 %v1167_v59, %v2737_v13  ;;  %v1265_v44 = vrot.slane %v1257_v5, 4 }
 0x24a   : > { %v1289_v12 = vrot.slane %v1261_v52, 4  ;;  %v1287_v59 = vrot.slane %v1286_v58, 1  ;;  %v1282_v7 = vadd.f32 %v1281_v27, %v1280_v57 }
 0x24b   : > { %v2048_v8 = vpop.eup %2047  ;;  %v1152_v21 = vmul.f32 0.044715, %v1135_v4  ;;  %v1183_v60 = vmul.f32 0.7978846, %v1175_v3  ;;  %v1266_v34 = vadd.f32 %v1265_v44, %v1257_v5  ;;  %v1144_v13 = vmul.f32 0.5, %v1135_v4 }
 0x24c   : > { %v1198_v10 = vadd.f32 1.0, %v2048_v8  ;;  %v1290_v62 = vadd.f32 %v1289_v12, %v1261_v52  ;;  %v1288_v8 = vadd.f32 %v1287_v59, %v1286_v58 }
 0x24d   : > { %v1160_v20 = vmul.f32 %v1152_v21, %v1135_v4  ;;  %2049 = vtanh.f32 %v1183_v60  ;;  %v1267_v42 = vrot.slane %v1266_v34, 2 }
 0x24e   : > { %v1206_v15 = vmul.f32 %v1198_v10, %v1142_v54  ;;  %v1291_v49 = vrot.slane %v1290_v62, 2  ;;  %v1332_v10 = vpack.c.bf16 %v1282_v7, %v1282_v7  ;;  %v1333_v44 = vpack.c.bf16 %v1288_v8, %v1288_v8 }
 0x24f   : > { %v1168_v28 = vmul.f32 %v1160_v20, %v1135_v4  ;;  %v1268_v47 = vadd.f32 %v1267_v42, %v1266_v34 }
 0x250   : > { %v1262_v19 = vmul.f32 %v1245_v26, %v1206_v15  ;;  %v1292_v25 = vadd.f32 %v1291_v49, %v1290_v62  ;;  %v1364_v12 = vunpack.c.l.b16 %v1332_v10  ;;  %v1365_v29 = vunpack.c.l.b16 %v1333_v44  ;;  %v2003_v10 = vld [vmem:[%s2811_s14] ss:$0 sm:$0xff] }
 0x251   : > { %v1176_v31 = vadd.f32 %v1168_v28, %v1135_v4  ;;  %v1269_v48 = vrot.slane %v1268_v47, 1  ;;  %v1331_v4 = vpack.c.bf16 %v1276_v2, %v1276_v2  ;;  %v2004_v44 = vld [vmem:[#allocation2] ss:$0 sm:$0xff] }
 0x252   : > { %v1295_v17 = vrot.slane %v1262_v19, 4  ;;  %v1293_v40 = vrot.slane %v1292_v25, 1 }
 0x253   : > { %v2050_v9 = vpop.eup %2049  ;;  %v1184_v37 = vmul.f32 0.7978846, %v1176_v31  ;;  %v1270_v32 = vadd.f32 %v1269_v48, %v1268_v47  ;;  %v1363_v22 = vunpack.c.l.b16 %v1331_v4 }
 0x254   : > { %v1296_v38 = vadd.f32 %v1295_v17, %v1262_v19  ;;  %v1199_v24 = vadd.f32 1.0, %v2050_v9  ;;  %v1294_v21 = vadd.f32 %v1293_v40, %v1292_v25 }
 0x255   : > { %2051 = vtanh.f32 %v1184_v37  ;;  %v1330_v20 = vpack.c.bf16 %v1270_v32, %v1270_v32 }
 0x256   : > { %v1207_v50 = vmul.f32 %v1199_v24, %v1143_v39  ;;  %v1297_v56 = vrot.slane %v1296_v38, 2  ;;  %v1334_v15 = vpack.c.bf16 %v1294_v21, %v1294_v21 }
 0x257   : > { %v1362_v19 = vunpack.c.l.b16 %v1330_v20 }
 0x258   : > { %v1263_v45 = vmul.f32 %v1250_v53, %v1207_v50  ;;  %v1298_v63 = vadd.f32 %v1297_v56, %v1296_v38  ;;  %v1366_v34 = vunpack.c.l.b16 %v1334_v15  ;;  %v2000_v53 = vld [vmem:[%s2808_s11] ss:$0 sm:$0xff] }
 0x259   : > { %v1371_v35 = vsel %vm1370_vm8, %v1363_v22, %v1362_v19 }
 0x25a   : > { %v1301_v55 = vrot.slane %v1263_v45, 4  ;;  %v1299_v3 = vrot.slane %v1298_v63, 1  ;;  %v1373_v30 = vsel %vm1372_vm9, %v1364_v12, %v1371_v35 }
 0x25b   : > { %v2052_v61 = vpop.eup %2051  ;;  %v1375_v38 = vsel %vm1374_vm10, %v1365_v29, %v1373_v30 }
 0x25c   : > { %v1200_v0 = vadd.f32 1.0, %v2052_v61  ;;  %v1302_v51 = vadd.f32 %v1301_v55, %v1263_v45  ;;  %v1300_v60 = vadd.f32 %v1299_v3, %v1298_v63  ;;  %v1377_v39 = vsel %vm1376_vm11, %v1366_v34, %v1375_v38  ;;  %v2002_v3 = vld [vmem:[%s2810_s13] ss:$0 sm:$0xff] }
 0x25e   : > { %v1208_v14 = vmul.f32 %v1200_v0, %v1144_v13  ;;  %v1303_v46 = vrot.slane %v1302_v51, 2  ;;  %v1335_v23 = vpack.c.bf16 %v1300_v60, %v1300_v60 }
 0x260   : > { %v1304_v5 = vadd.f32 %v1303_v46, %v1302_v51  ;;  %v1264_v6 = vmul.f32 %v1255_v1, %v1208_v14  ;;  %v1367_v17 = vunpack.c.l.b16 %v1335_v23  ;;  %v2001_v1 = vld [vmem:[%s2809_s12] ss:$0 sm:$0xff] }
 0x262   : > { %v1305_v36 = vrot.slane %v1304_v5, 1  ;;  %v1307_v52 = vrot.slane %v1264_v6, 4  ;;  %v1379_v41 = vsel %vm1378_vm12, %v1367_v17, %v1377_v39 }
 0x264   : > { %v1308_v54 = vadd.f32 %v1307_v52, %v1264_v6  ;;  %v1306_v11 = vadd.f32 %v1305_v36, %v1304_v5 }
 0x266   : > { %v1309_v16 = vrot.slane %v1308_v54, 2  ;;  %v1336_v28 = vpack.c.bf16 %v1306_v11, %v1306_v11 }
 0x268   : > { %v1310_v26 = vadd.f32 %v1309_v16, %v1308_v54  ;;  %v1368_v62 = vunpack.c.l.b16 %v1336_v28 }
 0x26a   : > { %v1311_v31 = vrot.slane %v1310_v26, 1  ;;  %v1381_v42 = vsel %vm1380_vm13, %v1368_v62, %v1379_v41 }
 0x26c   : > { %v1312_v9 = vadd.f32 %v1311_v31, %v1310_v26 }
 0x26e   : > { %v1337_v37 = vpack.c.bf16 %v1312_v9, %v1312_v9 }
 0x270   : > { %v1369_v24 = vunpack.c.l.b16 %v1337_v37 }
 0x272   : > { %v1383_v43 = vsel %vm1382_vm14, %v1369_v24, %v1381_v42 }
 0x273   : > { %v1384_v50 = vpack.c.b16 %v1383_v43, %v1383_v43 }
 0x275   : > { %1442 = vmatmul.bf16.vlgmr.msra.gmra.mxu2 %v1384_v50 }
 0x2b9   : > { %v1504_v18 = vpop.f32.mrf.mxu3 }
 0x2c1   : > { %v1506_v49 = vpop.f32.mrf.mxu3 }
 0x2f8   : > { %v1443_v56 = vpop.f32.mrf.mxu2 }
 0x2f9   : > { %v1505_v45 = vadd.f32 %v1504_v18, %v1443_v56 }
 0x2fb   : > { %v1512_v57 = vadd.f32 %v2000_v53, %v1505_v45 }
 0x2fd   : > { %1515 = vadd.xlane.f32.xlu1 %v1512_v57  ;;  %v1518_v47 = vmul.f32 %v1512_v57, %v1512_v57 }
 0x2ff   : > { %1519 = vadd.xlane.f32.xlu0 %v1518_v47 }
 0x300   : > { %v1445_v58 = vpop.f32.mrf.mxu2 }
 0x370   : > { %v1516_v55 = vpop.xlane.xlu1 %1515 }
 0x371   : > { %v1517_v61 = vmul.f32 0.03125, %v1516_v55 }
 0x372   : > { %v1520_v33 = vpop.xlane.xlu0 %1519 }
 0x373   : > { %v1522_v25 = vmul.f32 %v1517_v61, %v1517_v61  ;;  %v1521_v63 = vmul.f32 0.03125, %v1520_v33  ;;  %v1524_v40 = vsub.f32 %v1512_v57, %v1517_v61 }
 0x375   : > { %v1523_v13 = vsub.f32 %v1521_v63, %v1522_v25 }
 0x377   : > { %v1525_v0 = vadd.f32 1e-05, %v1523_v13 }
 0x379   : > { %2053 = vrsqrt.f32 %v1525_v0  ;;  %vm1532_vm0 = vweird.f32 %v1525_v0 }
 0x37f   : > { %v2054_v51 = vpop.eup %2053 }
 0x380   : > { %v1527_v27 = vmul.f32 %v2054_v51, %v1525_v0  ;;  %vm1533_vm15 = vweird.f32 %v2054_v51 }
 0x381   : > { %vm1534_vm1 = vmor %vm1532_vm0, %vm1533_vm15 }
 0x382   : > { %v1528_v48 = vmul.f32 %v2054_v51, %v1527_v27 }
 0x384   : > { %v1529_v59 = vmul.f32 0.5, %v1528_v48 }
 0x386   : > { %v1530_v14 = vsub.f32 1.5, %v1529_v59 }
 0x388   : > { %v1531_v46 = vmul.f32 %v2054_v51, %v1530_v14 }
 0x38a   : > { %v1535_v2 = vsel %vm1534_vm1, %v2054_v51, %v1531_v46 }
 0x38b   : > { %v1536_v5 = vmul.f32 %v1535_v2, %v1524_v40 }
 0x38d   : > { %v1540_v6 = vmul.f32 %v2001_v1, %v1536_v5 }
 0x38f   : > { %v1544_v7 = vadd.f32 %v2002_v3, %v1540_v6 }
 0x391   : > { %v1546_v32 = vmul.f32 0.044715, %v1544_v7  ;;  %v1545_v60 = vmul.f32 0.5, %v1544_v7 }
 0x393   : > { %v1547_v8 = vmul.f32 %v1546_v32, %v1544_v7 }
 0x395   : > { %v1548_v36 = vmul.f32 %v1547_v8, %v1544_v7 }
 0x397   : > { %v1549_v52 = vadd.f32 %v1548_v36, %v1544_v7 }
 0x399   : > { %v1550_v21 = vmul.f32 0.7978846, %v1549_v52 }
 0x39b   : > { %2055 = vtanh.f32 %v1550_v21 }
 0x3a1   : > { %v2056_v4 = vpop.eup %2055 }
 0x3a2   : > { %v1552_v54 = vadd.f32 1.0, %v2056_v4 }
 0x3a4   : > { %v1553_v11 = vmul.f32 %v1552_v54, %v1545_v60 }
 0x3a6   : > { %v1558_v20 = vmul.f32 %v2003_v10, %v1553_v11 }
 0x3a8   : > { %1559 = vadd.xlane.f32.xlu2 %v1558_v20 }
 0x41b   : > { %v1560_v16 = vpop.xlane.xlu2 %1559 }
 0x41c   : > { %v1565_v15 = vadd.f32 %v2004_v44, %v1560_v16 }
 0x41e   : > { %1568 = vperm.xlu1 %1993, %v1565_v15  }
 0x490   : > { %v1569_v22 = vpop.permute.xlu1 %1568 }
 0x491   : > { %1571 = vst [vmem:[%s622_s28] sm:$0xff] %v1569_v22 }
 0x492   : > { %2204 = shalt.err (!%p2201_p10)
}
 0x493   : > { %1927 = dma.vmem_to_hbm [thread:$0]  (%p2423_p13), %s1586_s0, 128, %s1588_s19, %s1573_s18  }
 0x494 PF: > { %s2838_s21 = sld [smem:[#allocation16_spill]]  ;;  %p2840_p11 = scmp.ge.s32.totalorder %s2251_s26, 2 }
 0x496   : > { %p1944_p0 = pnand %p2840_p11, %p2428_p4 }
 0x498   : > { %p1945_p2 = pneg %p1944_p0 }
 0x49a   : > { %s1599_s20 = sand.u32 1, %s2838_s21  }
 0x49b   : > { %s1600_s27 = scalar_lea.sflag [#allocation5], %s1599_s20 }
 0x49c   : > { %2234 = dma.done.wait (%p1945_p2), %s1600_s27, 128  }
 0x49d   : > { %2236 = vsyncadd (%p1945_p2), %s1600_s27, 4294967168  ;;  %s2841_s26 = sld [smem:[#allocation18_spill]]  ;;  %s2844_s23 = smov %s2243_s24 }
 0x49e   : > { %s2842_s9 = sld [smem:[#allocation17_spill]] }
 0x49f   : > { %s2843_s25 = sld [smem:[#allocation19_spill]] }
 0x4a3   : > { %p33_p6 = scmp.ge.s32.totalorder %s2841_s26, 4  }
 0x4a4   : > { %s2845_s24 = smov %s2842_s9 }
 0x4a5   :  { %35 = sbr.rel (!%p33_p6) target bundleno = 12 (0xc), region = 147 }
 0x4aa   :  { %1606 = vsyncpa [#allocation4], 1 }
 0x4ab   :  { %1608 = vsyncpa [#allocation4 + $0x1], 1 }
 0x4ac   :  { %1609 = vsyncpa [#allocation7], 1 }
 0x4ad   :  { %1610 = vsyncpa [#allocation10], 1 }
 0x4ae   :  { %1611 = vsyncpa [#allocation5], 1 }
 0x4af   :  { %1613 = vsyncpa [#allocation5 + $0x1], 1 }

</bundles_post_ra>
